<compile_context>
chip_gen: v5e
topology: v5e:2x2
jax: 0.10.0
libtpu: 0.0.40
codegen_flags: <defaults>
</compile_context>

<pallas_src>
import functools

import numpy as np

import jax
import jax.numpy as jnp
from jax.experimental import pallas as pl
from jax.experimental.pallas import tpu as pltpu


# -------------------------- assumed vision_Net geometry ----------------------
_K = 3            # conv kernel size
_S = 2            # conv stride
_C1 = 16          # conv1 output channels
_C2 = 32          # conv2 output channels
_NTAP = _K * _K   # 9 conv2 taps (dy1, dx1)
_NPOS = 9         # 9 conv2 output positions (3x3 output)
_RB = 8           # batch rows per grid step (f32 sublane multiple)


def _conv_patch_indices():
    """Image (row, col) indices for every (conv2 tap k, conv2 position p, dy0, dx0).

    For conv2 output position p=(oh2,ow2) and tap k=(dy1,dx1), the contributing
    conv1 output sits at (2*oh2+dy1, 2*ow2+dx1), whose conv1 input window starts
    at twice that position.  Duplicating conv1 patches per tap here folds conv2's
    im2col into the (cheap, XLA-side) gather, so the kernel only needs plain,
    aligned matmuls with the real conv weights."""
    rows = np.zeros((_NTAP, _NPOS, _K, _K), np.int32)
    cols = np.zeros((_NTAP, _NPOS, _K, _K), np.int32)
    for k in range(_NTAP):
        dy1, dx1 = divmod(k, _K)
        for p in range(_NPOS):
            oh2, ow2 = divmod(p, _K)
            r1 = _S * oh2 + dy1
            c1 = _S * ow2 + dx1
            for dy0 in range(_K):
                for dx0 in range(_K):
                    rows[k, p, dy0, dx0] = _S * r1 + dy0
                    cols[k, p, dy0, dx0] = _S * c1 + dx0
    return rows, cols


_ROWS_IDX, _COLS_IDX = _conv_patch_indices()


# ------------------------------ the fused kernel ------------------------------
def _fused_forward_kernel(patches_ref, inner_ref,
                          w1_ref, b1_ref, w2_ref, b2_ref, wv_ref, bv_ref,
                          p1a_ref, p1b_ref, pb1_ref, p2_ref, pb2_ref,
                          p3_ref, pb3_ref, o_ref):
    f32, bf16 = jnp.float32, jnp.bfloat16
    rb = inner_ref.shape[0]          # batch rows in this chunk
    blk = _NPOS * rb                 # rows per conv2 tap: ordered (position, row)

    w1 = w1_ref[...]                 # (27, C1) bf16  -- real conv1 weight
    b1 = b1_ref[...]                 # (1, C1)  f32

    # conv1 + conv2 (both 3x3 / stride 2), accumulated per tap k = (dy1, dx1):
    #   h1_k = relu(patches_k @ w1 + b1);   acc2 += h1_k @ w2[k]
    acc2 = jnp.zeros((blk, _C2), f32)
    for k in range(_NTAP):
        pk = patches_ref[pl.ds(k * blk, blk), :].astype(bf16)          # (blk, 27)
        h1k = jnp.dot(pk, w1, preferred_element_type=f32) + b1
        h1k = jnp.maximum(h1k, 0.0).astype(bf16)                       # (blk, C1)
        acc2 = acc2 + jnp.dot(h1k, w2_ref[k], preferred_element_type=f32)
    z2 = jnp.maximum(acc2 + b2_ref[...], 0.0)        # (9*rb, C2) f32, rows (pos, b)

    # vision final Linear: the PyTorch NCHW flatten is folded into per-position
    # (C2, latent) weight blocks, so no in-kernel reshape/transpose is needed.
    facc = jnp.zeros((rb, wv_ref.shape[2]), f32)
    for p in range(_NPOS):
        zp = z2[p * rb:(p + 1) * rb, :].astype(bf16)                   # (rb, C2)
        facc = facc + jnp.dot(zp, wv_ref[p], preferred_element_type=f32)
    feat = jnp.maximum(facc + bv_ref[...], 0.0)                        # (rb, latent)

    # pipe layer 1: concat([inner_state, features]) @ W done as two row-block dots.
    h = (jnp.dot(inner_ref[...].astype(bf16), p1a_ref[...], preferred_element_type=f32)
         + jnp.dot(feat.astype(bf16), p1b_ref[...], preferred_element_type=f32)
         + pb1_ref[...])
    h = jnp.maximum(h, 0.0)
    # pipe layer 2.
    h = jnp.dot(h.astype(bf16), p2_ref[...], preferred_element_type=f32) + pb2_ref[...]
    h = jnp.maximum(h, 0.0)
    # pipe last layer (no activation); lane-padded to 128 for an unmasked store.
    y = jnp.dot(h.astype(bf16), p3_ref[...], preferred_element_type=f32) + pb3_ref[...]
    o_ref[...] = y.astype(o_ref.dtype)


# ---------------------------------- wrapper -----------------------------------
@functools.partial(jax.jit, static_argnames=("c_dim",))
def visual_continuous_concept_forward(params, inner_state, outer_state_nchw, *, c_dim):
    B, in_ch, H, W = outer_state_nchw.shape
    assert H == 16 and W == 16, "assumed vision_Net geometry: 16x16 -> 7x7 -> 3x3"
    s_dim = inner_state.shape[1]
    n_chunks = (B + _RB - 1) // _RB
    b_tot = n_chunks * _RB
    patch_feat = _K * _K * in_ch
    out_pad = params["p3"].shape[1]
    latent = params["p1b"].shape[1]

    # Cheap XLA-side prep: batch pad to a sublane multiple + im2col gather.
    x = jnp.transpose(outer_state_nchw, (0, 2, 3, 1))                  # NHWC
    x = jnp.pad(x, ((0, b_tot - B), (0, 0), (0, 0), (0, 0)))
    inner = jnp.pad(inner_state, ((0, b_tot - B), (0, 0)))
    g = x[:, _ROWS_IDX, _COLS_IDX, :]                                  # (b_tot, 9, 9, 3, 3, C)
    g = g.reshape(n_chunks, _RB, _NTAP, _NPOS, _K, _K, in_ch)
    g = jnp.transpose(g, (0, 2, 3, 1, 4, 5, 6))                        # (chunk, k, pos, b, dy, dx, c)
    patches = g.reshape(n_chunks * _NTAP * _NPOS * _RB, patch_feat)

    args = (patches, inner,
            params["w1"], params["b1"], params["w2"], params["b2"],
            params["wv"], params["bv"],
            params["p1a"], params["p1b"], params["pb1"],
            params["p2"], params["pb2"], params["p3"], params["pb3"])

    # Activations stream per row-chunk; every weight/bias uses a constant
    # index_map so it is DMA'd once and stays VMEM-resident across the grid.
    def _rowchunk(shape):
        return pl.BlockSpec(shape, lambda i: (i, 0))

    def _resident(a):
        nd = len(a.shape)
        return pl.BlockSpec(a.shape, (lambda i, _nd=nd: (0,) * _nd))

    in_specs = [_rowchunk((_NTAP * _NPOS * _RB, patch_feat)),
                _rowchunk((_RB, s_dim))] + [_resident(a) for a in args[2:]]

    blk = _NPOS * _RB
    flops = 2 * n_chunks * (
        _NTAP * blk * (patch_feat * _C1 + _C1 * _C2)                   # conv1 + conv2
        + _NPOS * _RB * _C2 * latent                                   # vision linear
        + _RB * (s_dim * latent + latent * latent + latent * latent + latent * out_pad))
    bytes_accessed = (sum(int(a.size) * a.dtype.itemsize for a in args)
                      + b_tot * out_pad * 4)

    out = pl.pallas_call(
        _fused_forward_kernel,
        out_shape=jax.ShapeDtypeStruct((b_tot, out_pad), jnp.float32),
        grid_spec=pltpu.PrefetchScalarGridSpec(
            num_scalar_prefetch=0,
            grid=(n_chunks,),
            in_specs=in_specs,
            out_specs=pl.BlockSpec((_RB, out_pad), lambda i: (i, 0)),
        ),
        compiler_params=pltpu.CompilerParams(
            dimension_semantics=("parallel",)),
        cost_estimate=pl.CostEstimate(flops=flops, transcendentals=0,
                                      bytes_accessed=bytes_accessed),
    )(*args)
    return out[:B, :c_dim]


# ------------------------- synthetic parameter init ---------------------------
def init_params(key, s_dim, vision_latent_dim, c_dim, latent_dim, in_ch):
    """Returns (raw f32 weights for the independent reference, kernel params)."""
    # cat([inner_state (s_dim), features]) feeds a pipe expecting s_dim+latent_dim.
    assert vision_latent_dim == latent_dim, \
        "vision_latent_dim must equal latent_dim for the concat/pipe shapes to line up"
    ks = jax.random.split(key, 6)

    def mat(k, shape, fan_in, scale=None):
        s = scale if scale is not None else 1.0 / np.sqrt(fan_in)
        return np.asarray(jax.random.normal(k, shape, jnp.float32)) * s

    flat = _C2 * _NPOS
    raw = {
        # conv weights in PyTorch OIHW layout, bias included (zero init)
        "w1": mat(ks[0], (_C1, in_ch, _K, _K), _K * _K * in_ch),
        "b1": np.zeros((_C1,), np.float32),
        "w2": mat(ks[1], (_C2, _C1, _K, _K), _K * _K * _C1),
        "b2": np.zeros((_C2,), np.float32),
        # vision Linear acting on the NCHW flatten (row index = c*9 + p)
        "wv": mat(ks[2], (flat, vision_latent_dim), flat),
        "bv": np.zeros((vision_latent_dim,), np.float32),
        # pipe: (s_dim+latent) -> latent -> latent -> c_dim
        "p1": mat(ks[3], (s_dim + latent_dim, latent_dim), s_dim + latent_dim),
        "pb1": np.zeros((latent_dim,), np.float32),
        "p2": mat(ks[4], (latent_dim, latent_dim), latent_dim),
        "pb2": np.zeros((latent_dim,), np.float32),
        "p3": mat(ks[5], (latent_dim, c_dim), latent_dim, scale=0.01),  # ~orthogonal_(0.01)
        "pb3": np.zeros((c_dim,), np.float32),
    }

    # ---- kernel layouts (real conv weights, no dense expansion) ----
    out_pad = ((c_dim + 127) // 128) * 128
    w1_mat = raw["w1"].transpose(2, 3, 1, 0).reshape(_K * _K * in_ch, _C1)    # rows (dy0,dx0,ci)
    w2_tap = raw["w2"].transpose(2, 3, 1, 0).reshape(_NTAP, _C1, _C2)         # [k, ci, co]
    wv_pos = raw["wv"].reshape(_C2, _NPOS, vision_latent_dim).transpose(1, 0, 2)  # [p, c, :]
    p3_pad = np.zeros((latent_dim, out_pad), np.float32)
    p3_pad[:, :c_dim] = raw["p3"]
    pb3_pad = np.zeros((out_pad,), np.float32)
    pb3_pad[:c_dim] = raw["pb3"]

    bf16, f32 = jnp.bfloat16, jnp.float32
    params = {
        # MXU operands in bf16 (f32 accumulation in-kernel)
        "w1": jnp.asarray(w1_mat, bf16),
        "w2": jnp.asarray(w2_tap, bf16),
        "wv": jnp.asarray(wv_pos, bf16),
        "p1a": jnp.asarray(raw["p1"][:s_dim], bf16),
        "p1b": jnp.asarray(raw["p1"][s_dim:], bf16),
        "p2": jnp.asarray(raw["p2"], bf16),
        "p3": jnp.asarray(p3_pad, bf16),
        # biases stay f32, (1, N) for broadcast (bias/ReLU path stays f32 on-chip)
        "b1": jnp.asarray(raw["b1"], f32)[None, :],
        "b2": jnp.asarray(raw["b2"], f32)[None, :],
        "bv": jnp.asarray(raw["bv"], f32)[None, :],
        "pb1": jnp.asarray(raw["pb1"], f32)[None, :],
        "pb2": jnp.asarray(raw["pb2"], f32)[None, :],
        "pb3": jnp.asarray(pb3_pad, f32)[None, :],
    }
    return raw, params


# ---------------- independent f32 reference (real convolutions) ---------------
def forward_reference(raw, inner_state, outer_state_nchw):
    dn = ("NCHW", "OIHW", "NCHW")
    h = jax.lax.conv_general_dilated(outer_state_nchw, raw["w1"], (_S, _S),
                                     "VALID", dimension_numbers=dn)
    h = jnp.maximum(h + raw["b1"][None, :, None, None], 0.0)
    h = jax.lax.conv_general_dilated(h, raw["w2"], (_S, _S),
                                     "VALID", dimension_numbers=dn)
    h = jnp.maximum(h + raw["b2"][None, :, None, None], 0.0)
    flat = h.reshape(h.shape[0], -1)                      # PyTorch .view(B, -1) on NCHW
    feat = jnp.maximum(flat @ raw["wv"] + raw["bv"], 0.0)
    state = jnp.concatenate([inner_state, feat], axis=1)
    h = jnp.maximum(state @ raw["p1"] + raw["pb1"], 0.0)
    h = jnp.maximum(h @ raw["p2"] + raw["pb2"], 0.0)
    return h @ raw["p3"] + raw["pb3"]


if __name__ == "__main__":
    B = 2
    S_DIM = 8
    LATENT_DIM = 32
    VISION_LATENT_DIM = 32     # must equal LATENT_DIM (asserted in init_params)
    C_DIM = 10
    IN_CH = 3
    IMG = 16                   # 16 -> 7 -> 3 with the 3x3 / stride-2 conv stack

    key = jax.random.PRNGKey(0)
    k_params, k_inner, k_outer = jax.random.split(key, 3)

    raw, params = init_params(k_params, S_DIM, VISION_LATENT_DIM, C_DIM,
                              LATENT_DIM, IN_CH)
    inner_state = jax.random.normal(k_inner, (B, S_DIM), jnp.float32)
    outer_state = jax.random.normal(k_outer, (B, IN_CH, IMG, IMG), jnp.float32)  # NCHW

    code = jax.block_until_ready(
        visual_continuous_concept_forward(params, inner_state, outer_state,
                                          c_dim=C_DIM))

    assert code.shape == (B, C_DIM), code.shape
    assert bool(jnp.all(jnp.isfinite(code)))

    ref = forward_reference(raw, inner_state, outer_state)
    max_err = float(jnp.max(jnp.abs(code - ref)))
    assert bool(jnp.allclose(code, ref, rtol=5e-2, atol=1e-2)), max_err

    print("KERNEL_OK")
</pallas_src>

<mosaic_0001>
module attributes {stable_mosaic.version = 11 : i64} {
  func.func @_fused_forward_kernel(%arg0: i32, %arg1: memref<648x27xf32, #tpu.memory_space<vmem>>, %arg2: memref<8x8xf32, #tpu.memory_space<vmem>>, %arg3: memref<27x16xbf16, #tpu.memory_space<vmem>>, %arg4: memref<1x16xf32, #tpu.memory_space<vmem>>, %arg5: memref<9x16x32xbf16, #tpu.memory_space<vmem>>, %arg6: memref<1x32xf32, #tpu.memory_space<vmem>>, %arg7: memref<9x32x32xbf16, #tpu.memory_space<vmem>>, %arg8: memref<1x32xf32, #tpu.memory_space<vmem>>, %arg9: memref<8x32xbf16, #tpu.memory_space<vmem>>, %arg10: memref<32x32xbf16, #tpu.memory_space<vmem>>, %arg11: memref<1x32xf32, #tpu.memory_space<vmem>>, %arg12: memref<32x32xbf16, #tpu.memory_space<vmem>>, %arg13: memref<1x32xf32, #tpu.memory_space<vmem>>, %arg14: memref<32x128xbf16, #tpu.memory_space<vmem>>, %arg15: memref<1x128xf32, #tpu.memory_space<vmem>>, %arg16: memref<8x128xf32, #tpu.memory_space<vmem>>) attributes {dimension_semantics = [#tpu.dimension_semantics<parallel>], iteration_bounds = array<i64: 1>, scalar_prefetch = 0 : i64, scratch_operands = 0 : i64, tpu.core_type = #tpu.core_type<tc>, window_params = [{transform_indices = @transform_0, window_bounds = array<i64: 648, 27>}, {transform_indices = @transform_1, window_bounds = array<i64: 8, 8>}, {pipeline_mode = #tpu.pipeline_mode<synchronous>, transform_indices = @transform_2, window_bounds = array<i64: 27, 16>}, {pipeline_mode = #tpu.pipeline_mode<synchronous>, transform_indices = @transform_3, window_bounds = array<i64: 1, 16>}, {pipeline_mode = #tpu.pipeline_mode<synchronous>, transform_indices = @transform_4, window_bounds = array<i64: 9, 16, 32>}, {pipeline_mode = #tpu.pipeline_mode<synchronous>, transform_indices = @transform_5, window_bounds = array<i64: 1, 32>}, {pipeline_mode = #tpu.pipeline_mode<synchronous>, transform_indices = @transform_6, window_bounds = array<i64: 9, 32, 32>}, {pipeline_mode = #tpu.pipeline_mode<synchronous>, transform_indices = @transform_7, window_bounds = array<i64: 1, 32>}, {pipeline_mode = #tpu.pipeline_mode<synchronous>, transform_indices = @transform_8, window_bounds = array<i64: 8, 32>}, {pipeline_mode = #tpu.pipeline_mode<synchronous>, transform_indices = @transform_9, window_bounds = array<i64: 32, 32>}, {pipeline_mode = #tpu.pipeline_mode<synchronous>, transform_indices = @transform_10, window_bounds = array<i64: 1, 32>}, {pipeline_mode = #tpu.pipeline_mode<synchronous>, transform_indices = @transform_11, window_bounds = array<i64: 32, 32>}, {pipeline_mode = #tpu.pipeline_mode<synchronous>, transform_indices = @transform_12, window_bounds = array<i64: 1, 32>}, {pipeline_mode = #tpu.pipeline_mode<synchronous>, transform_indices = @transform_13, window_bounds = array<i64: 32, 128>}, {pipeline_mode = #tpu.pipeline_mode<synchronous>, transform_indices = @transform_14, window_bounds = array<i64: 1, 128>}, {transform_indices = @transform_15, window_bounds = array<i64: 8, 128>}]} {
    %c0 = arith.constant 0 : index
    %c0_0 = arith.constant 0 : index
    %0 = vector.load %arg3[%c0, %c0_0] : memref<27x16xbf16, #tpu.memory_space<vmem>>, vector<27x16xbf16>
    %c0_1 = arith.constant 0 : index
    %c0_2 = arith.constant 0 : index
    %1 = vector.load %arg4[%c0_1, %c0_2] : memref<1x16xf32, #tpu.memory_space<vmem>>, vector<1x16xf32>
    %cst = arith.constant 0.000000e+00 : f32
    %2 = vector.broadcast %cst : f32 to vector<72x32xf32>
    %c0_3 = arith.constant 0 : index
    %c0_4 = arith.constant 0 : index
    %3 = vector.load %arg1[%c0_3, %c0_4] : memref<648x27xf32, #tpu.memory_space<vmem>>, vector<72x27xf32>
    %4 = arith.truncf %3 : vector<72x27xf32> to vector<72x27xbf16>
    %cst_5 = arith.constant dense<0.000000e+00> : vector<72x16xf32>
    %5 = tpu.matmul %4, %0, %cst_5 {dimension_numbers = #tpu.dot_dimension_numbers<[1], [0], [0], [1], [0, 0, 1, 1], [], []>} : vector<72x27xbf16>, vector<27x16xbf16>, vector<72x16xf32> -> vector<72x16xf32>
    %6 = vector.broadcast %1 : vector<1x16xf32> to vector<72x16xf32>
    %7 = arith.addf %5, %6 : vector<72x16xf32>
    %cst_6 = arith.constant 0.000000e+00 : f32
    %8 = vector.broadcast %cst_6 : f32 to vector<72x16xf32>
    %9 = arith.maximumf %7, %8 : vector<72x16xf32>
    %10 = arith.truncf %9 : vector<72x16xf32> to vector<72x16xbf16>
    %c0_7 = arith.constant 0 : index
    %c0_8 = arith.constant 0 : index
    %c0_9 = arith.constant 0 : index
    %11 = vector.load %arg5[%c0_7, %c0_8, %c0_9] : memref<9x16x32xbf16, #tpu.memory_space<vmem>>, vector<1x16x32xbf16>
    %12 = vector.shape_cast %11 : vector<1x16x32xbf16> to vector<16x32xbf16>
    %cst_10 = arith.constant dense<0.000000e+00> : vector<72x32xf32>
    %13 = tpu.matmul %10, %12, %cst_10 {dimension_numbers = #tpu.dot_dimension_numbers<[1], [0], [0], [1], [0, 0, 1, 1], [], []>} : vector<72x16xbf16>, vector<16x32xbf16>, vector<72x32xf32> -> vector<72x32xf32>
    %14 = arith.addf %2, %13 : vector<72x32xf32>
    %c72 = arith.constant 72 : index
    %c0_11 = arith.constant 0 : index
    %15 = vector.load %arg1[%c72, %c0_11] : memref<648x27xf32, #tpu.memory_space<vmem>>, vector<72x27xf32>
    %16 = arith.truncf %15 : vector<72x27xf32> to vector<72x27xbf16>
    %cst_12 = arith.constant dense<0.000000e+00> : vector<72x16xf32>
    %17 = tpu.matmul %16, %0, %cst_12 {dimension_numbers = #tpu.dot_dimension_numbers<[1], [0], [0], [1], [0, 0, 1, 1], [], []>} : vector<72x27xbf16>, vector<27x16xbf16>, vector<72x16xf32> -> vector<72x16xf32>
    %18 = vector.broadcast %1 : vector<1x16xf32> to vector<72x16xf32>
    %19 = arith.addf %17, %18 : vector<72x16xf32>
    %cst_13 = arith.constant 0.000000e+00 : f32
    %20 = vector.broadcast %cst_13 : f32 to vector<72x16xf32>
    %21 = arith.maximumf %19, %20 : vector<72x16xf32>
    %22 = arith.truncf %21 : vector<72x16xf32> to vector<72x16xbf16>
    %c1 = arith.constant 1 : index
    %c0_14 = arith.constant 0 : index
    %c0_15 = arith.constant 0 : index
    %23 = vector.load %arg5[%c1, %c0_14, %c0_15] : memref<9x16x32xbf16, #tpu.memory_space<vmem>>, vector<1x16x32xbf16>
    %24 = vector.shape_cast %23 : vector<1x16x32xbf16> to vector<16x32xbf16>
    %cst_16 = arith.constant dense<0.000000e+00> : vector<72x32xf32>
    %25 = tpu.matmul %22, %24, %cst_16 {dimension_numbers = #tpu.dot_dimension_numbers<[1], [0], [0], [1], [0, 0, 1, 1], [], []>} : vector<72x16xbf16>, vector<16x32xbf16>, vector<72x32xf32> -> vector<72x32xf32>
    %26 = arith.addf %14, %25 : vector<72x32xf32>
    %c144 = arith.constant 144 : index
    %c0_17 = arith.constant 0 : index
    %27 = vector.load %arg1[%c144, %c0_17] : memref<648x27xf32, #tpu.memory_space<vmem>>, vector<72x27xf32>
    %28 = arith.truncf %27 : vector<72x27xf32> to vector<72x27xbf16>
    %cst_18 = arith.constant dense<0.000000e+00> : vector<72x16xf32>
    %29 = tpu.matmul %28, %0, %cst_18 {dimension_numbers = #tpu.dot_dimension_numbers<[1], [0], [0], [1], [0, 0, 1, 1], [], []>} : vector<72x27xbf16>, vector<27x16xbf16>, vector<72x16xf32> -> vector<72x16xf32>
    %30 = vector.broadcast %1 : vector<1x16xf32> to vector<72x16xf32>
    %31 = arith.addf %29, %30 : vector<72x16xf32>
    %cst_19 = arith.constant 0.000000e+00 : f32
    %32 = vector.broadcast %cst_19 : f32 to vector<72x16xf32>
    %33 = arith.maximumf %31, %32 : vector<72x16xf32>
    %34 = arith.truncf %33 : vector<72x16xf32> to vector<72x16xbf16>
    %c2 = arith.constant 2 : index
    %c0_20 = arith.constant 0 : index
    %c0_21 = arith.constant 0 : index
    %35 = vector.load %arg5[%c2, %c0_20, %c0_21] : memref<9x16x32xbf16, #tpu.memory_space<vmem>>, vector<1x16x32xbf16>
    %36 = vector.shape_cast %35 : vector<1x16x32xbf16> to vector<16x32xbf16>
    %cst_22 = arith.constant dense<0.000000e+00> : vector<72x32xf32>
    %37 = tpu.matmul %34, %36, %cst_22 {dimension_numbers = #tpu.dot_dimension_numbers<[1], [0], [0], [1], [0, 0, 1, 1], [], []>} : vector<72x16xbf16>, vector<16x32xbf16>, vector<72x32xf32> -> vector<72x32xf32>
    %38 = arith.addf %26, %37 : vector<72x32xf32>
    %c216 = arith.constant 216 : index
    %c0_23 = arith.constant 0 : index
    %39 = vector.load %arg1[%c216, %c0_23] : memref<648x27xf32, #tpu.memory_space<vmem>>, vector<72x27xf32>
    %40 = arith.truncf %39 : vector<72x27xf32> to vector<72x27xbf16>
    %cst_24 = arith.constant dense<0.000000e+00> : vector<72x16xf32>
    %41 = tpu.matmul %40, %0, %cst_24 {dimension_numbers = #tpu.dot_dimension_numbers<[1], [0], [0], [1], [0, 0, 1, 1], [], []>} : vector<72x27xbf16>, vector<27x16xbf16>, vector<72x16xf32> -> vector<72x16xf32>
    %42 = vector.broadcast %1 : vector<1x16xf32> to vector<72x16xf32>
    %43 = arith.addf %41, %42 : vector<72x16xf32>
    %cst_25 = arith.constant 0.000000e+00 : f32
    %44 = vector.broadcast %cst_25 : f32 to vector<72x16xf32>
    %45 = arith.maximumf %43, %44 : vector<72x16xf32>
    %46 = arith.truncf %45 : vector<72x16xf32> to vector<72x16xbf16>
    %c3 = arith.constant 3 : index
    %c0_26 = arith.constant 0 : index
    %c0_27 = arith.constant 0 : index
    %47 = vector.load %arg5[%c3, %c0_26, %c0_27] : memref<9x16x32xbf16, #tpu.memory_space<vmem>>, vector<1x16x32xbf16>
    %48 = vector.shape_cast %47 : vector<1x16x32xbf16> to vector<16x32xbf16>
    %cst_28 = arith.constant dense<0.000000e+00> : vector<72x32xf32>
    %49 = tpu.matmul %46, %48, %cst_28 {dimension_numbers = #tpu.dot_dimension_numbers<[1], [0], [0], [1], [0, 0, 1, 1], [], []>} : vector<72x16xbf16>, vector<16x32xbf16>, vector<72x32xf32> -> vector<72x32xf32>
    %50 = arith.addf %38, %49 : vector<72x32xf32>
    %c288 = arith.constant 288 : index
    %c0_29 = arith.constant 0 : index
    %51 = vector.load %arg1[%c288, %c0_29] : memref<648x27xf32, #tpu.memory_space<vmem>>, vector<72x27xf32>
    %52 = arith.truncf %51 : vector<72x27xf32> to vector<72x27xbf16>
    %cst_30 = arith.constant dense<0.000000e+00> : vector<72x16xf32>
    %53 = tpu.matmul %52, %0, %cst_30 {dimension_numbers = #tpu.dot_dimension_numbers<[1], [0], [0], [1], [0, 0, 1, 1], [], []>} : vector<72x27xbf16>, vector<27x16xbf16>, vector<72x16xf32> -> vector<72x16xf32>
    %54 = vector.broadcast %1 : vector<1x16xf32> to vector<72x16xf32>
    %55 = arith.addf %53, %54 : vector<72x16xf32>
    %cst_31 = arith.constant 0.000000e+00 : f32
    %56 = vector.broadcast %cst_31 : f32 to vector<72x16xf32>
    %57 = arith.maximumf %55, %56 : vector<72x16xf32>
    %58 = arith.truncf %57 : vector<72x16xf32> to vector<72x16xbf16>
    %c4 = arith.constant 4 : index
    %c0_32 = arith.constant 0 : index
    %c0_33 = arith.constant 0 : index
    %59 = vector.load %arg5[%c4, %c0_32, %c0_33] : memref<9x16x32xbf16, #tpu.memory_space<vmem>>, vector<1x16x32xbf16>
    %60 = vector.shape_cast %59 : vector<1x16x32xbf16> to vector<16x32xbf16>
    %cst_34 = arith.constant dense<0.000000e+00> : vector<72x32xf32>
    %61 = tpu.matmul %58, %60, %cst_34 {dimension_numbers = #tpu.dot_dimension_numbers<[1], [0], [0], [1], [0, 0, 1, 1], [], []>} : vector<72x16xbf16>, vector<16x32xbf16>, vector<72x32xf32> -> vector<72x32xf32>
    %62 = arith.addf %50, %61 : vector<72x32xf32>
    %c360 = arith.constant 360 : index
    %c0_35 = arith.constant 0 : index
    %63 = vector.load %arg1[%c360, %c0_35] : memref<648x27xf32, #tpu.memory_space<vmem>>, vector<72x27xf32>
    %64 = arith.truncf %63 : vector<72x27xf32> to vector<72x27xbf16>
    %cst_36 = arith.constant dense<0.000000e+00> : vector<72x16xf32>
    %65 = tpu.matmul %64, %0, %cst_36 {dimension_numbers = #tpu.dot_dimension_numbers<[1], [0], [0], [1], [0, 0, 1, 1], [], []>} : vector<72x27xbf16>, vector<27x16xbf16>, vector<72x16xf32> -> vector<72x16xf32>
    %66 = vector.broadcast %1 : vector<1x16xf32> to vector<72x16xf32>
    %67 = arith.addf %65, %66 : vector<72x16xf32>
    %cst_37 = arith.constant 0.000000e+00 : f32
    %68 = vector.broadcast %cst_37 : f32 to vector<72x16xf32>
    %69 = arith.maximumf %67, %68 : vector<72x16xf32>
    %70 = arith.truncf %69 : vector<72x16xf32> to vector<72x16xbf16>
    %c5 = arith.constant 5 : index
    %c0_38 = arith.constant 0 : index
    %c0_39 = arith.constant 0 : index
    %71 = vector.load %arg5[%c5, %c0_38, %c0_39] : memref<9x16x32xbf16, #tpu.memory_space<vmem>>, vector<1x16x32xbf16>
    %72 = vector.shape_cast %71 : vector<1x16x32xbf16> to vector<16x32xbf16>
    %cst_40 = arith.constant dense<0.000000e+00> : vector<72x32xf32>
    %73 = tpu.matmul %70, %72, %cst_40 {dimension_numbers = #tpu.dot_dimension_numbers<[1], [0], [0], [1], [0, 0, 1, 1], [], []>} : vector<72x16xbf16>, vector<16x32xbf16>, vector<72x32xf32> -> vector<72x32xf32>
    %74 = arith.addf %62, %73 : vector<72x32xf32>
    %c432 = arith.constant 432 : index
    %c0_41 = arith.constant 0 : index
    %75 = vector.load %arg1[%c432, %c0_41] : memref<648x27xf32, #tpu.memory_space<vmem>>, vector<72x27xf32>
    %76 = arith.truncf %75 : vector<72x27xf32> to vector<72x27xbf16>
    %cst_42 = arith.constant dense<0.000000e+00> : vector<72x16xf32>
    %77 = tpu.matmul %76, %0, %cst_42 {dimension_numbers = #tpu.dot_dimension_numbers<[1], [0], [0], [1], [0, 0, 1, 1], [], []>} : vector<72x27xbf16>, vector<27x16xbf16>, vector<72x16xf32> -> vector<72x16xf32>
    %78 = vector.broadcast %1 : vector<1x16xf32> to vector<72x16xf32>
    %79 = arith.addf %77, %78 : vector<72x16xf32>
    %cst_43 = arith.constant 0.000000e+00 : f32
    %80 = vector.broadcast %cst_43 : f32 to vector<72x16xf32>
    %81 = arith.maximumf %79, %80 : vector<72x16xf32>
    %82 = arith.truncf %81 : vector<72x16xf32> to vector<72x16xbf16>
    %c6 = arith.constant 6 : index
    %c0_44 = arith.constant 0 : index
    %c0_45 = arith.constant 0 : index
    %83 = vector.load %arg5[%c6, %c0_44, %c0_45] : memref<9x16x32xbf16, #tpu.memory_space<vmem>>, vector<1x16x32xbf16>
    %84 = vector.shape_cast %83 : vector<1x16x32xbf16> to vector<16x32xbf16>
    %cst_46 = arith.constant dense<0.000000e+00> : vector<72x32xf32>
    %85 = tpu.matmul %82, %84, %cst_46 {dimension_numbers = #tpu.dot_dimension_numbers<[1], [0], [0], [1], [0, 0, 1, 1], [], []>} : vector<72x16xbf16>, vector<16x32xbf16>, vector<72x32xf32> -> vector<72x32xf32>
    %86 = arith.addf %74, %85 : vector<72x32xf32>
    %c504 = arith.constant 504 : index
    %c0_47 = arith.constant 0 : index
    %87 = vector.load %arg1[%c504, %c0_47] : memref<648x27xf32, #tpu.memory_space<vmem>>, vector<72x27xf32>
    %88 = arith.truncf %87 : vector<72x27xf32> to vector<72x27xbf16>
    %cst_48 = arith.constant dense<0.000000e+00> : vector<72x16xf32>
    %89 = tpu.matmul %88, %0, %cst_48 {dimension_numbers = #tpu.dot_dimension_numbers<[1], [0], [0], [1], [0, 0, 1, 1], [], []>} : vector<72x27xbf16>, vector<27x16xbf16>, vector<72x16xf32> -> vector<72x16xf32>
    %90 = vector.broadcast %1 : vector<1x16xf32> to vector<72x16xf32>
    %91 = arith.addf %89, %90 : vector<72x16xf32>
    %cst_49 = arith.constant 0.000000e+00 : f32
    %92 = vector.broadcast %cst_49 : f32 to vector<72x16xf32>
    %93 = arith.maximumf %91, %92 : vector<72x16xf32>
    %94 = arith.truncf %93 : vector<72x16xf32> to vector<72x16xbf16>
    %c7 = arith.constant 7 : index
    %c0_50 = arith.constant 0 : index
    %c0_51 = arith.constant 0 : index
    %95 = vector.load %arg5[%c7, %c0_50, %c0_51] : memref<9x16x32xbf16, #tpu.memory_space<vmem>>, vector<1x16x32xbf16>
    %96 = vector.shape_cast %95 : vector<1x16x32xbf16> to vector<16x32xbf16>
    %cst_52 = arith.constant dense<0.000000e+00> : vector<72x32xf32>
    %97 = tpu.matmul %94, %96, %cst_52 {dimension_numbers = #tpu.dot_dimension_numbers<[1], [0], [0], [1], [0, 0, 1, 1], [], []>} : vector<72x16xbf16>, vector<16x32xbf16>, vector<72x32xf32> -> vector<72x32xf32>
    %98 = arith.addf %86, %97 : vector<72x32xf32>
    %c576 = arith.constant 576 : index
    %c0_53 = arith.constant 0 : index
    %99 = vector.load %arg1[%c576, %c0_53] : memref<648x27xf32, #tpu.memory_space<vmem>>, vector<72x27xf32>
    %100 = arith.truncf %99 : vector<72x27xf32> to vector<72x27xbf16>
    %cst_54 = arith.constant dense<0.000000e+00> : vector<72x16xf32>
    %101 = tpu.matmul %100, %0, %cst_54 {dimension_numbers = #tpu.dot_dimension_numbers<[1], [0], [0], [1], [0, 0, 1, 1], [], []>} : vector<72x27xbf16>, vector<27x16xbf16>, vector<72x16xf32> -> vector<72x16xf32>
    %102 = vector.broadcast %1 : vector<1x16xf32> to vector<72x16xf32>
    %103 = arith.addf %101, %102 : vector<72x16xf32>
    %cst_55 = arith.constant 0.000000e+00 : f32
    %104 = vector.broadcast %cst_55 : f32 to vector<72x16xf32>
    %105 = arith.maximumf %103, %104 : vector<72x16xf32>
    %106 = arith.truncf %105 : vector<72x16xf32> to vector<72x16xbf16>
    %c8 = arith.constant 8 : index
    %c0_56 = arith.constant 0 : index
    %c0_57 = arith.constant 0 : index
    %107 = vector.load %arg5[%c8, %c0_56, %c0_57] : memref<9x16x32xbf16, #tpu.memory_space<vmem>>, vector<1x16x32xbf16>
    %108 = vector.shape_cast %107 : vector<1x16x32xbf16> to vector<16x32xbf16>
    %cst_58 = arith.constant dense<0.000000e+00> : vector<72x32xf32>
    %109 = tpu.matmul %106, %108, %cst_58 {dimension_numbers = #tpu.dot_dimension_numbers<[1], [0], [0], [1], [0, 0, 1, 1], [], []>} : vector<72x16xbf16>, vector<16x32xbf16>, vector<72x32xf32> -> vector<72x32xf32>
    %110 = arith.addf %98, %109 : vector<72x32xf32>
    %c0_59 = arith.constant 0 : index
    %c0_60 = arith.constant 0 : index
    %111 = vector.load %arg6[%c0_59, %c0_60] : memref<1x32xf32, #tpu.memory_space<vmem>>, vector<1x32xf32>
    %112 = vector.broadcast %111 : vector<1x32xf32> to vector<72x32xf32>
    %113 = arith.addf %110, %112 : vector<72x32xf32>
    %cst_61 = arith.constant 0.000000e+00 : f32
    %114 = vector.broadcast %cst_61 : f32 to vector<72x32xf32>
    %115 = arith.maximumf %113, %114 : vector<72x32xf32>
    %cst_62 = arith.constant 0.000000e+00 : f32
    %116 = vector.broadcast %cst_62 : f32 to vector<8x32xf32>
    %117 = vector.extract_strided_slice %115 {offsets = [0, 0], sizes = [8, 32], strides = [1, 1]} : vector<72x32xf32> to vector<8x32xf32>
    %118 = arith.truncf %117 : vector<8x32xf32> to vector<8x32xbf16>
    %c0_63 = arith.constant 0 : index
    %c0_64 = arith.constant 0 : index
    %c0_65 = arith.constant 0 : index
    %119 = vector.load %arg7[%c0_63, %c0_64, %c0_65] : memref<9x32x32xbf16, #tpu.memory_space<vmem>>, vector<1x32x32xbf16>
    %120 = vector.shape_cast %119 : vector<1x32x32xbf16> to vector<32x32xbf16>
    %cst_66 = arith.constant dense<0.000000e+00> : vector<8x32xf32>
    %121 = tpu.matmul %118, %120, %cst_66 {dimension_numbers = #tpu.dot_dimension_numbers<[1], [0], [0], [1], [0, 0, 1, 1], [], []>} : vector<8x32xbf16>, vector<32x32xbf16>, vector<8x32xf32> -> vector<8x32xf32>
    %122 = arith.addf %116, %121 : vector<8x32xf32>
    %123 = vector.extract_strided_slice %115 {offsets = [8, 0], sizes = [8, 32], strides = [1, 1]} : vector<72x32xf32> to vector<8x32xf32>
    %124 = arith.truncf %123 : vector<8x32xf32> to vector<8x32xbf16>
    %c1_67 = arith.constant 1 : index
    %c0_68 = arith.constant 0 : index
    %c0_69 = arith.constant 0 : index
    %125 = vector.load %arg7[%c1_67, %c0_68, %c0_69] : memref<9x32x32xbf16, #tpu.memory_space<vmem>>, vector<1x32x32xbf16>
    %126 = vector.shape_cast %125 : vector<1x32x32xbf16> to vector<32x32xbf16>
    %cst_70 = arith.constant dense<0.000000e+00> : vector<8x32xf32>
    %127 = tpu.matmul %124, %126, %cst_70 {dimension_numbers = #tpu.dot_dimension_numbers<[1], [0], [0], [1], [0, 0, 1, 1], [], []>} : vector<8x32xbf16>, vector<32x32xbf16>, vector<8x32xf32> -> vector<8x32xf32>
    %128 = arith.addf %122, %127 : vector<8x32xf32>
    %129 = vector.extract_strided_slice %115 {offsets = [16, 0], sizes = [8, 32], strides = [1, 1]} : vector<72x32xf32> to vector<8x32xf32>
    %130 = arith.truncf %129 : vector<8x32xf32> to vector<8x32xbf16>
    %c2_71 = arith.constant 2 : index
    %c0_72 = arith.constant 0 : index
    %c0_73 = arith.constant 0 : index
    %131 = vector.load %arg7[%c2_71, %c0_72, %c0_73] : memref<9x32x32xbf16, #tpu.memory_space<vmem>>, vector<1x32x32xbf16>
    %132 = vector.shape_cast %131 : vector<1x32x32xbf16> to vector<32x32xbf16>
    %cst_74 = arith.constant dense<0.000000e+00> : vector<8x32xf32>
    %133 = tpu.matmul %130, %132, %cst_74 {dimension_numbers = #tpu.dot_dimension_numbers<[1], [0], [0], [1], [0, 0, 1, 1], [], []>} : vector<8x32xbf16>, vector<32x32xbf16>, vector<8x32xf32> -> vector<8x32xf32>
    %134 = arith.addf %128, %133 : vector<8x32xf32>
    %135 = vector.extract_strided_slice %115 {offsets = [24, 0], sizes = [8, 32], strides = [1, 1]} : vector<72x32xf32> to vector<8x32xf32>
    %136 = arith.truncf %135 : vector<8x32xf32> to vector<8x32xbf16>
    %c3_75 = arith.constant 3 : index
    %c0_76 = arith.constant 0 : index
    %c0_77 = arith.constant 0 : index
    %137 = vector.load %arg7[%c3_75, %c0_76, %c0_77] : memref<9x32x32xbf16, #tpu.memory_space<vmem>>, vector<1x32x32xbf16>
    %138 = vector.shape_cast %137 : vector<1x32x32xbf16> to vector<32x32xbf16>
    %cst_78 = arith.constant dense<0.000000e+00> : vector<8x32xf32>
    %139 = tpu.matmul %136, %138, %cst_78 {dimension_numbers = #tpu.dot_dimension_numbers<[1], [0], [0], [1], [0, 0, 1, 1], [], []>} : vector<8x32xbf16>, vector<32x32xbf16>, vector<8x32xf32> -> vector<8x32xf32>
    %140 = arith.addf %134, %139 : vector<8x32xf32>
    %141 = vector.extract_strided_slice %115 {offsets = [32, 0], sizes = [8, 32], strides = [1, 1]} : vector<72x32xf32> to vector<8x32xf32>
    %142 = arith.truncf %141 : vector<8x32xf32> to vector<8x32xbf16>
    %c4_79 = arith.constant 4 : index
    %c0_80 = arith.constant 0 : index
    %c0_81 = arith.constant 0 : index
    %143 = vector.load %arg7[%c4_79, %c0_80, %c0_81] : memref<9x32x32xbf16, #tpu.memory_space<vmem>>, vector<1x32x32xbf16>
    %144 = vector.shape_cast %143 : vector<1x32x32xbf16> to vector<32x32xbf16>
    %cst_82 = arith.constant dense<0.000000e+00> : vector<8x32xf32>
    %145 = tpu.matmul %142, %144, %cst_82 {dimension_numbers = #tpu.dot_dimension_numbers<[1], [0], [0], [1], [0, 0, 1, 1], [], []>} : vector<8x32xbf16>, vector<32x32xbf16>, vector<8x32xf32> -> vector<8x32xf32>
    %146 = arith.addf %140, %145 : vector<8x32xf32>
    %147 = vector.extract_strided_slice %115 {offsets = [40, 0], sizes = [8, 32], strides = [1, 1]} : vector<72x32xf32> to vector<8x32xf32>
    %148 = arith.truncf %147 : vector<8x32xf32> to vector<8x32xbf16>
    %c5_83 = arith.constant 5 : index
    %c0_84 = arith.constant 0 : index
    %c0_85 = arith.constant 0 : index
    %149 = vector.load %arg7[%c5_83, %c0_84, %c0_85] : memref<9x32x32xbf16, #tpu.memory_space<vmem>>, vector<1x32x32xbf16>
    %150 = vector.shape_cast %149 : vector<1x32x32xbf16> to vector<32x32xbf16>
    %cst_86 = arith.constant dense<0.000000e+00> : vector<8x32xf32>
    %151 = tpu.matmul %148, %150, %cst_86 {dimension_numbers = #tpu.dot_dimension_numbers<[1], [0], [0], [1], [0, 0, 1, 1], [], []>} : vector<8x32xbf16>, vector<32x32xbf16>, vector<8x32xf32> -> vector<8x32xf32>
    %152 = arith.addf %146, %151 : vector<8x32xf32>
    %153 = vector.extract_strided_slice %115 {offsets = [48, 0], sizes = [8, 32], strides = [1, 1]} : vector<72x32xf32> to vector<8x32xf32>
    %154 = arith.truncf %153 : vector<8x32xf32> to vector<8x32xbf16>
    %c6_87 = arith.constant 6 : index
    %c0_88 = arith.constant 0 : index
    %c0_89 = arith.constant 0 : index
    %155 = vector.load %arg7[%c6_87, %c0_88, %c0_89] : memref<9x32x32xbf16, #tpu.memory_space<vmem>>, vector<1x32x32xbf16>
    %156 = vector.shape_cast %155 : vector<1x32x32xbf16> to vector<32x32xbf16>
    %cst_90 = arith.constant dense<0.000000e+00> : vector<8x32xf32>
    %157 = tpu.matmul %154, %156, %cst_90 {dimension_numbers = #tpu.dot_dimension_numbers<[1], [0], [0], [1], [0, 0, 1, 1], [], []>} : vector<8x32xbf16>, vector<32x32xbf16>, vector<8x32xf32> -> vector<8x32xf32>
    %158 = arith.addf %152, %157 : vector<8x32xf32>
    %159 = vector.extract_strided_slice %115 {offsets = [56, 0], sizes = [8, 32], strides = [1, 1]} : vector<72x32xf32> to vector<8x32xf32>
    %160 = arith.truncf %159 : vector<8x32xf32> to vector<8x32xbf16>
    %c7_91 = arith.constant 7 : index
    %c0_92 = arith.constant 0 : index
    %c0_93 = arith.constant 0 : index
    %161 = vector.load %arg7[%c7_91, %c0_92, %c0_93] : memref<9x32x32xbf16, #tpu.memory_space<vmem>>, vector<1x32x32xbf16>
    %162 = vector.shape_cast %161 : vector<1x32x32xbf16> to vector<32x32xbf16>
    %cst_94 = arith.constant dense<0.000000e+00> : vector<8x32xf32>
    %163 = tpu.matmul %160, %162, %cst_94 {dimension_numbers = #tpu.dot_dimension_numbers<[1], [0], [0], [1], [0, 0, 1, 1], [], []>} : vector<8x32xbf16>, vector<32x32xbf16>, vector<8x32xf32> -> vector<8x32xf32>
    %164 = arith.addf %158, %163 : vector<8x32xf32>
    %165 = vector.extract_strided_slice %115 {offsets = [64, 0], sizes = [8, 32], strides = [1, 1]} : vector<72x32xf32> to vector<8x32xf32>
    %166 = arith.truncf %165 : vector<8x32xf32> to vector<8x32xbf16>
    %c8_95 = arith.constant 8 : index
    %c0_96 = arith.constant 0 : index
    %c0_97 = arith.constant 0 : index
    %167 = vector.load %arg7[%c8_95, %c0_96, %c0_97] : memref<9x32x32xbf16, #tpu.memory_space<vmem>>, vector<1x32x32xbf16>
    %168 = vector.shape_cast %167 : vector<1x32x32xbf16> to vector<32x32xbf16>
    %cst_98 = arith.constant dense<0.000000e+00> : vector<8x32xf32>
    %169 = tpu.matmul %166, %168, %cst_98 {dimension_numbers = #tpu.dot_dimension_numbers<[1], [0], [0], [1], [0, 0, 1, 1], [], []>} : vector<8x32xbf16>, vector<32x32xbf16>, vector<8x32xf32> -> vector<8x32xf32>
    %170 = arith.addf %164, %169 : vector<8x32xf32>
    %c0_99 = arith.constant 0 : index
    %c0_100 = arith.constant 0 : index
    %171 = vector.load %arg8[%c0_99, %c0_100] : memref<1x32xf32, #tpu.memory_space<vmem>>, vector<1x32xf32>
    %172 = vector.broadcast %171 : vector<1x32xf32> to vector<8x32xf32>
    %173 = arith.addf %170, %172 : vector<8x32xf32>
    %cst_101 = arith.constant 0.000000e+00 : f32
    %174 = vector.broadcast %cst_101 : f32 to vector<8x32xf32>
    %175 = arith.maximumf %173, %174 : vector<8x32xf32>
    %c0_102 = arith.constant 0 : index
    %c0_103 = arith.constant 0 : index
    %176 = vector.load %arg2[%c0_102, %c0_103] : memref<8x8xf32, #tpu.memory_space<vmem>>, vector<8x8xf32>
    %177 = arith.truncf %176 : vector<8x8xf32> to vector<8x8xbf16>
    %c0_104 = arith.constant 0 : index
    %c0_105 = arith.constant 0 : index
    %178 = vector.load %arg9[%c0_104, %c0_105] : memref<8x32xbf16, #tpu.memory_space<vmem>>, vector<8x32xbf16>
    %cst_106 = arith.constant dense<0.000000e+00> : vector<8x32xf32>
    %179 = tpu.matmul %177, %178, %cst_106 {dimension_numbers = #tpu.dot_dimension_numbers<[1], [0], [0], [1], [0, 0, 1, 1], [], []>} : vector<8x8xbf16>, vector<8x32xbf16>, vector<8x32xf32> -> vector<8x32xf32>
    %180 = arith.truncf %175 : vector<8x32xf32> to vector<8x32xbf16>
    %c0_107 = arith.constant 0 : index
    %c0_108 = arith.constant 0 : index
    %181 = vector.load %arg10[%c0_107, %c0_108] : memref<32x32xbf16, #tpu.memory_space<vmem>>, vector<32x32xbf16>
    %cst_109 = arith.constant dense<0.000000e+00> : vector<8x32xf32>
    %182 = tpu.matmul %180, %181, %cst_109 {dimension_numbers = #tpu.dot_dimension_numbers<[1], [0], [0], [1], [0, 0, 1, 1], [], []>} : vector<8x32xbf16>, vector<32x32xbf16>, vector<8x32xf32> -> vector<8x32xf32>
    %183 = arith.addf %179, %182 : vector<8x32xf32>
    %c0_110 = arith.constant 0 : index
    %c0_111 = arith.constant 0 : index
    %184 = vector.load %arg11[%c0_110, %c0_111] : memref<1x32xf32, #tpu.memory_space<vmem>>, vector<1x32xf32>
    %185 = vector.broadcast %184 : vector<1x32xf32> to vector<8x32xf32>
    %186 = arith.addf %183, %185 : vector<8x32xf32>
    %cst_112 = arith.constant 0.000000e+00 : f32
    %187 = vector.broadcast %cst_112 : f32 to vector<8x32xf32>
    %188 = arith.maximumf %186, %187 : vector<8x32xf32>
    %189 = arith.truncf %188 : vector<8x32xf32> to vector<8x32xbf16>
    %c0_113 = arith.constant 0 : index
    %c0_114 = arith.constant 0 : index
    %190 = vector.load %arg12[%c0_113, %c0_114] : memref<32x32xbf16, #tpu.memory_space<vmem>>, vector<32x32xbf16>
    %cst_115 = arith.constant dense<0.000000e+00> : vector<8x32xf32>
    %191 = tpu.matmul %189, %190, %cst_115 {dimension_numbers = #tpu.dot_dimension_numbers<[1], [0], [0], [1], [0, 0, 1, 1], [], []>} : vector<8x32xbf16>, vector<32x32xbf16>, vector<8x32xf32> -> vector<8x32xf32>
    %c0_116 = arith.constant 0 : index
    %c0_117 = arith.constant 0 : index
    %192 = vector.load %arg13[%c0_116, %c0_117] : memref<1x32xf32, #tpu.memory_space<vmem>>, vector<1x32xf32>
    %193 = vector.broadcast %192 : vector<1x32xf32> to vector<8x32xf32>
    %194 = arith.addf %191, %193 : vector<8x32xf32>
    %cst_118 = arith.constant 0.000000e+00 : f32
    %195 = vector.broadcast %cst_118 : f32 to vector<8x32xf32>
    %196 = arith.maximumf %194, %195 : vector<8x32xf32>
    %197 = arith.truncf %196 : vector<8x32xf32> to vector<8x32xbf16>
    %c0_119 = arith.constant 0 : index
    %c0_120 = arith.constant 0 : index
    %198 = vector.load %arg14[%c0_119, %c0_120] : memref<32x128xbf16, #tpu.memory_space<vmem>>, vector<32x128xbf16>
    %cst_121 = arith.constant dense<0.000000e+00> : vector<8x128xf32>
    %199 = tpu.matmul %197, %198, %cst_121 {dimension_numbers = #tpu.dot_dimension_numbers<[1], [0], [0], [1], [0, 0, 1, 1], [], []>} : vector<8x32xbf16>, vector<32x128xbf16>, vector<8x128xf32> -> vector<8x128xf32>
    %c0_122 = arith.constant 0 : index
    %c0_123 = arith.constant 0 : index
    %200 = vector.load %arg15[%c0_122, %c0_123] : memref<1x128xf32, #tpu.memory_space<vmem>>, vector<1x128xf32>
    %201 = vector.broadcast %200 : vector<1x128xf32> to vector<8x128xf32>
    %202 = arith.addf %199, %201 : vector<8x128xf32>
    %c0_124 = arith.constant 0 : index
    %c0_125 = arith.constant 0 : index
    %203 = vector.load %arg16[%c0_124, %c0_125] : memref<8x128xf32, #tpu.memory_space<vmem>>, vector<8x128xf32>
    tpu.vector_store %arg16[%c0_124, %c0_125], %202 {strides = array<i32>} : memref<8x128xf32, #tpu.memory_space<vmem>>, vector<8x128xf32>,
    return
  }
  func.func @transform_0(%arg0: i32) -> (i32, i32) {
    %c0_i32 = arith.constant 0 : i32
    %c0_i32_0 = arith.constant 0 : i32
    return %arg0, %c0_i32 : i32, i32
  }
  func.func @transform_1(%arg0: i32) -> (i32, i32) {
    %c0_i32 = arith.constant 0 : i32
    %c0_i32_0 = arith.constant 0 : i32
    return %arg0, %c0_i32 : i32, i32
  }
  func.func @transform_2(%arg0: i32) -> (i32, i32) {
    %c0_i32 = arith.constant 0 : i32
    %c0_i32_0 = arith.constant 0 : i32
    %c0_i32_1 = arith.constant 0 : i32
    return %c0_i32, %c0_i32_0 : i32, i32
  }
  func.func @transform_3(%arg0: i32) -> (i32, i32) {
    %c0_i32 = arith.constant 0 : i32
    %c0_i32_0 = arith.constant 0 : i32
    %c0_i32_1 = arith.constant 0 : i32
    return %c0_i32, %c0_i32_0 : i32, i32
  }
  func.func @transform_4(%arg0: i32) -> (i32, i32, i32) {
    %c0_i32 = arith.constant 0 : i32
    %c0_i32_0 = arith.constant 0 : i32
    %c0_i32_1 = arith.constant 0 : i32
    %c0_i32_2 = arith.constant 0 : i32
    return %c0_i32, %c0_i32_0, %c0_i32_1 : i32, i32, i32
  }
  func.func @transform_5(%arg0: i32) -> (i32, i32) {
    %c0_i32 = arith.constant 0 : i32
    %c0_i32_0 = arith.constant 0 : i32
    %c0_i32_1 = arith.constant 0 : i32
    return %c0_i32, %c0_i32_0 : i32, i32
  }
  func.func @transform_6(%arg0: i32) -> (i32, i32, i32) {
    %c0_i32 = arith.constant 0 : i32
    %c0_i32_0 = arith.constant 0 : i32
    %c0_i32_1 = arith.constant 0 : i32
    %c0_i32_2 = arith.constant 0 : i32
    return %c0_i32, %c0_i32_0, %c0_i32_1 : i32, i32, i32
  }
  func.func @transform_7(%arg0: i32) -> (i32, i32) {
    %c0_i32 = arith.constant 0 : i32
    %c0_i32_0 = arith.constant 0 : i32
    %c0_i32_1 = arith.constant 0 : i32
    return %c0_i32, %c0_i32_0 : i32, i32
  }
  func.func @transform_8(%arg0: i32) -> (i32, i32) {
    %c0_i32 = arith.constant 0 : i32
    %c0_i32_0 = arith.constant 0 : i32
    %c0_i32_1 = arith.constant 0 : i32
    return %c0_i32, %c0_i32_0 : i32, i32
  }
  func.func @transform_9(%arg0: i32) -> (i32, i32) {
    %c0_i32 = arith.constant 0 : i32
    %c0_i32_0 = arith.constant 0 : i32
    %c0_i32_1 = arith.constant 0 : i32
    return %c0_i32, %c0_i32_0 : i32, i32
  }
  func.func @transform_10(%arg0: i32) -> (i32, i32) {
    %c0_i32 = arith.constant 0 : i32
    %c0_i32_0 = arith.constant 0 : i32
    %c0_i32_1 = arith.constant 0 : i32
    return %c0_i32, %c0_i32_0 : i32, i32
  }
  func.func @transform_11(%arg0: i32) -> (i32, i32) {
    %c0_i32 = arith.constant 0 : i32
    %c0_i32_0 = arith.constant 0 : i32
    %c0_i32_1 = arith.constant 0 : i32
    return %c0_i32, %c0_i32_0 : i32, i32
  }
  func.func @transform_12(%arg0: i32) -> (i32, i32) {
    %c0_i32 = arith.constant 0 : i32
    %c0_i32_0 = arith.constant 0 : i32
    %c0_i32_1 = arith.constant 0 : i32
    return %c0_i32, %c0_i32_0 : i32, i32
  }
  func.func @transform_13(%arg0: i32) -> (i32, i32) {
    %c0_i32 = arith.constant 0 : i32
    %c0_i32_0 = arith.constant 0 : i32
    %c0_i32_1 = arith.constant 0 : i32
    return %c0_i32, %c0_i32_0 : i32, i32
  }
  func.func @transform_14(%arg0: i32) -> (i32, i32) {
    %c0_i32 = arith.constant 0 : i32
    %c0_i32_0 = arith.constant 0 : i32
    %c0_i32_1 = arith.constant 0 : i32
    return %c0_i32, %c0_i32_0 : i32, i32
  }
  func.func @transform_15(%arg0: i32) -> (i32, i32) {
    %c0_i32 = arith.constant 0 : i32
    %c0_i32_0 = arith.constant 0 : i32
    return %arg0, %c0_i32 : i32, i32
  }
}

</mosaic_0001>

<bundles_post_ra>
// kernel: visual_continuous_concept_forward.1
= control target key start
LH: loop header
LB: loop body
LE: loop exit
PB: predicated region body
PF: predicated region fallthrough
CT: control target
= control target key end

     0   :  { %vm100_vm0 = vcmask 1044480   ;;  %vm101_vm1 = vcmask 1045504   ;;  %v2156_v2 = vmov 65535   ;;  %vm84_vm2 = vcmask 220160   ;;  %s2955_s2 = inlined_call_operand.vmem [shape: bf16[27,16], index: 2, kind: input, shape index: {}]   ;;  %s2956_s0 = inlined_call_operand.vmem [shape: f32[648,27], index: 0, kind: input, shape index: {}]   ;;  %s2957_s3 = inlined_call_operand.vmem [shape: f32[1,16], index: 3, kind: input, shape index: {}]   ;;  %s2958_s4 = inlined_call_operand.vmem [shape: bf16[9,16,32], index: 4, kind: input, shape index: {}]   ;;  %s2959_s5 = inlined_call_operand.vmem [shape: f32[1,32], index: 5, kind: input, shape index: {}]   ;;  %s2960_s6 = inlined_call_operand.vmem [shape: bf16[9,32,32], index: 6, kind: input, shape index: {}]   ;;  %s2961_s8 = inlined_call_operand.vmem [shape: bf16[8,32], index: 8, kind: input, shape index: {}]   ;;  %s2962_s7 = inlined_call_operand.vmem [shape: f32[1,32], index: 7, kind: input, shape index: {}]   ;;  %s2963_s9 = inlined_call_operand.vmem [shape: bf16[32,32], index: 9, kind: input, shape index: {}]   ;;  %s2964_s1 = inlined_call_operand.vmem [shape: f32[8,8], index: 1, kind: input, shape index: {}]   ;;  %s2965_s10 = inlined_call_operand.vmem [shape: f32[1,32], index: 10, kind: input, shape index: {}]   ;;  %s2966_s11 = inlined_call_operand.vmem [shape: bf16[32,32], index: 11, kind: input, shape index: {}]   ;;  %s2967_s12 = inlined_call_operand.vmem [shape: f32[1,32], index: 12, kind: input, shape index: {}]   ;;  %s2968_s13 = inlined_call_operand.vmem [shape: bf16[32,128], index: 13, kind: input, shape index: {}]   ;;  %s2969_s14 = inlined_call_operand.vmem [shape: f32[1,128], index: 14, kind: input, shape index: {}]   ;;  %s2970_s15 = inlined_call_operand.vmem [shape: f32[8,128], index: 15, kind: output, shape index: {}]  }
   0x1   :  { %v1828_v0 = vld [vmem:[%s2955_s2 + $0x8] sm:$0xf]  ;;  %v2114_v1 = vld [vmem:[%s2955_s2 + $0x8] sm:$0x30]  ;;  %v102_v3 = vsel %vm100_vm0, 4294967295, %v2156_v2  ;;  %v2248_v7 = vld [vmem:[%s2955_s2] sm:$0xff] }
   0x2   :  { %v1829_v4 = vor.u32 %v2114_v1, %v1828_v0  ;;  %v103_v5 = vsel %vm101_vm1, %v102_v3, 0  ;;  %v56_v8 = vld [vmem:[%s2956_s0] sm:$0xff]  ;;  %v57_v9 = vld [vmem:[%s2956_s0 + $0x8] sm:$0xff]  ;;  %v157_v11 = vld [vmem:[%s2956_s0 + $0x50] sm:$0xff]  ;;  %vm241_vm3 = vcmask 130048   ;;  %vm1383_vm4 = vcmask 261120  }
   0x3   :  { %v156_v10 = vld [vmem:[%s2956_s0 + $0x48] sm:$0xff]  ;;  %v65_v12 = vpack.c.bf16 %v57_v9, %v56_v8  ;;  %v58_v14 = vld [vmem:[%s2956_s0 + $0x10] sm:$0xff]  ;;  %v59_v15 = vld [vmem:[%s2956_s0 + $0x18] sm:$0xff]  ;;  %vm1719_vm5 = vcmask 1043456   ;;  %vm1715_vm6 = vcmask 64512  }
   0x4   :  { %v2243_v6 = vand.u32 %v1829_v4, %v103_v5  ;;  %v165_v13 = vpack.c.bf16 %v157_v11, %v156_v10  ;;  %v158_v16 = vld [vmem:[%s2956_s0 + $0x58] sm:$0xff]  ;;  %v159_v17 = vld [vmem:[%s2956_s0 + $0x60] sm:$0xff]  ;;  %v66_v18 = vpack.c.bf16 %v59_v15, %v58_v14  ;;  %v61_v21 = vld [vmem:[%s2956_s0 + $0x28] sm:$0xff] }
   0x5   :  { %v166_v19 = vpack.c.bf16 %v159_v17, %v158_v16  ;;  %v60_v20 = vld [vmem:[%s2956_s0 + $0x20] sm:$0xff]  ;;  %v160_v22 = vld [vmem:[%s2956_s0 + $0x68] sm:$0xff]  ;;  %v161_v23 = vld [vmem:[%s2956_s0 + $0x70] sm:$0xff] }
   0x6   :  { %113 = vmatpush.bf16.msra.mxu0 %v2243_v6  ;;  %191 = vmatpush.bf16.msra.mxu1 %v2243_v6  ;;  %v67_v24 = vpack.c.bf16 %v61_v21, %v60_v20  ;;  %v167_v25 = vpack.c.bf16 %v161_v23, %v160_v22  ;;  %v62_v26 = vld [vmem:[%s2956_s0 + $0x30] sm:$0xff]  ;;  %v63_v27 = vld [vmem:[%s2956_s0 + $0x38] sm:$0xff]  ;;  %v163_v29 = vld [vmem:[%s2956_s0 + $0x80] sm:$0xff] }
   0x7   :  { %v162_v28 = vld [vmem:[%s2956_s0 + $0x78] sm:$0xff]  ;;  %v68_v30 = vpack.c.bf16 %v63_v27, %v62_v26  ;;  %v164_v32 = vld [vmem:[%s2956_s0 + $0x88] sm:$0xff]  ;;  %v64_v33 = vld [vmem:[%s2956_s0 + $0x40] sm:$0xff] }
   0x8   :  { %v168_v31 = vpack.c.bf16 %v163_v29, %v162_v28  ;;  %v169_v34 = vpack.c.bf16 %v164_v32, %v164_v32  ;;  %v69_v35 = vpack.c.bf16 %v64_v33, %v64_v33  ;;  %v2116_v36 = vld [vmem:[%s2958_s4 + $0x8] sm:$0xff]  ;;  %v2115_v37 = vld [vmem:[%s2958_s4] sm:$0xff]  ;;  %v486_v33 = vld [vmem:[%s2956_s0 + $0xd8] sm:$0xff] }
   0x9   :  { %264 = vmatpush.bf16.msra.mxu2 %v2116_v36  ;;  %318 = vmatpush.bf16.msra.mxu3 %v2115_v37  ;;  %v2333_v40 = vld [vmem:[%s2957_s3] ss:$0 sm:$0xff] }
   0xa   :  { %114 = vmatpush.bf16.msra.mxu0 %v2248_v7  ;;  %192 = vmatpush.bf16.msra.mxu1 %v2248_v7 }
   0xd   :  { %1830 = vmatmul.msk.bf16.vlgmr.msra.gmra.mxu0 %vm84_vm2, %v65_v12  ;;  %1835 = vmatmul.msk.bf16.vlgmr.msra.gmra.mxu1 %vm84_vm2, %v165_v13 }
   0xe   :  { %521 = vmatpush.bf16.msrb.mxu0 %v2243_v6  ;;  %379 = vmatpush.bf16.msrb.mxu2 %v2243_v6 }
  0x12   :  { %522 = vmatpush.bf16.msrb.mxu0 %v2248_v7  ;;  %380 = vmatpush.bf16.msrb.mxu2 %v2248_v7 }
  0x16   :  { %805 = vmatpush.bf16.msra.mxu0 %v2243_v6 }
  0x1a   :  { %806 = vmatpush.bf16.msra.mxu0 %v2248_v7 }
  0x1d   :  { %1831 = vmatmul.msk.bf16.gmra.mxu0 %vm84_vm2, %v66_v18  ;;  %1836 = vmatmul.msk.bf16.gmra.mxu1 %vm84_vm2, %v166_v19 }
  0x2d   :  { %1832 = vmatmul.msk.bf16.gmra.mxu0 %vm84_vm2, %v67_v24  ;;  %1837 = vmatmul.msk.bf16.gmra.mxu1 %vm84_vm2, %v167_v25 }
  0x3d   :  { %1833 = vmatmul.msk.bf16.gmra.mxu0 %vm84_vm2, %v68_v30  ;;  %1838 = vmatmul.msk.bf16.gmra.mxu1 %vm84_vm2, %v168_v31 }
  0x4d   :  { %1839 = vmatmul.msk.bf16.gmra.mxu1 %vm84_vm2, %v169_v34  ;;  %1834 = vmatmul.msk.bf16.gmra.mxu0 %vm84_vm2, %v69_v35  ;;  %v487_v34 = vld [vmem:[%s2956_s0 + $0xe0] sm:$0xff] }
  0x4e   :  { %v495_v37 = vpack.c.bf16 %v487_v34, %v486_v33  ;;  %v630_v33 = vld [vmem:[%s2956_s0 + $0x130] sm:$0xff]  ;;  %v631_v34 = vld [vmem:[%s2956_s0 + $0x138] sm:$0xff] }
  0x5d   :  { %1876 = vmatmul.msk.bf16.vlgmr.msrb.gmra.mxu0 %vm84_vm2, %v495_v37  ;;  %v638_v37 = vpack.c.bf16 %v631_v34, %v630_v33 }
  0x5e   :  { %1089 = vmatpush.bf16.msrb.mxu0 %v2243_v6 }
  0x62   :  { %1090 = vmatpush.bf16.msrb.mxu0 %v2248_v7 }
  0x8a   :  { %v116_v38 = vpop.f32.mrf.mxu0  ;;  %v194_v39 = vpop.f32.mrf.mxu1 }
  0x8b   :  { %v117_v41 = vadd.f32 %v2333_v40, %v116_v38  ;;  %v195_v42 = vadd.f32 %v2333_v40, %v194_v39 }
  0x8d   :  { %v140_v45 = vmax.f32 %v117_v41, 0.0  ;;  %v218_v48 = vmax.f32 %v195_v42, 0.0 }
  0x92   :  { %v118_v43 = vpop.f32.mrf.mxu0  ;;  %v196_v44 = vpop.f32.mrf.mxu1 }
  0x93   :  { %v119_v46 = vadd.f32 %v2333_v40, %v118_v43  ;;  %v197_v47 = vadd.f32 %v2333_v40, %v196_v44 }
  0x95   :  { %v141_v49 = vmax.f32 %v119_v46, 0.0  ;;  %v219_v50 = vmax.f32 %v197_v47, 0.0  ;;  %v488_v47 = vld [vmem:[%s2956_s0 + $0xe8] sm:$0xff] }
  0x97   :  { %v227_v51 = vpack.c.bf16 %v219_v50, %v218_v48  ;;  %v149_v52 = vpack.c.bf16 %v141_v49, %v140_v45  ;;  %v489_v48 = vld [vmem:[%s2956_s0 + $0xf0] sm:$0xff] }
  0x98   :  { %v496_v49 = vpack.c.bf16 %v489_v48, %v488_v47  ;;  %v344_v50 = vld [vmem:[%s2956_s0 + $0x90] sm:$0xff]  ;;  %v776_v47 = vld [vmem:[%s2956_s0 + $0x198] sm:$0xff]  ;;  %v777_v48 = vld [vmem:[%s2956_s0 + $0x1a0] sm:$0xff] }
  0x99   :  { %1846 = vmatmul.msk.bf16.vlgmr.msra.gmra.mxu2 %vm241_vm3, %v227_v51  ;;  %1855 = vmatmul.msk.bf16.vlgmr.msra.gmra.mxu3 %vm241_vm3, %v149_v52  ;;  %v345_v51 = vld [vmem:[%s2956_s0 + $0x98] sm:$0xff] }
  0x9a   :  { %v121_v53 = vpop.f32.mrf.mxu0  ;;  %v199_v54 = vpop.f32.mrf.mxu1  ;;  %663 = vmatpush.bf16.msra.mxu2 %v2243_v6  ;;  %1877 = vmatmul.msk.bf16.gmra.mxu0 %vm84_vm2, %v496_v49  ;;  %v353_v52 = vpack.c.bf16 %v345_v51, %v344_v50  ;;  %v782_v51 = vpack.c.bf16 %v777_v48, %v776_v47 }
  0x9b   :  { %v122_v55 = vadd.f32 %v2333_v40, %v121_v53  ;;  %v200_v56 = vadd.f32 %v2333_v40, %v199_v54  ;;  %v490_v53 = vld [vmem:[%s2956_s0 + $0xf8] sm:$0xff]  ;;  %v491_v54 = vld [vmem:[%s2956_s0 + $0x100] sm:$0xff] }
  0x9d   :  { %v142_v59 = vmax.f32 %v122_v55, 0.0  ;;  %v220_v62 = vmax.f32 %v200_v56, 0.0  ;;  %v497_v55 = vpack.c.bf16 %v491_v54, %v490_v53  ;;  %v346_v56 = vld [vmem:[%s2956_s0 + $0xa0] sm:$0xff] }
  0x9e   :  { %664 = vmatpush.bf16.msra.mxu2 %v2248_v7  ;;  %v2119_v53 = vld [vmem:[%s2958_s4 + $0x20] sm:$0xff] }
  0xa2   :  { %v123_v57 = vpop.f32.mrf.mxu0  ;;  %v201_v58 = vpop.f32.mrf.mxu1 }
  0xa3   :  { %v124_v60 = vadd.f32 %v2333_v40, %v123_v57  ;;  %v202_v61 = vadd.f32 %v2333_v40, %v201_v58  ;;  %v347_v57 = vld [vmem:[%s2956_s0 + $0xa8] sm:$0xff] }
  0xa4   :  { %v354_v58 = vpack.c.bf16 %v347_v57, %v346_v56 }
  0xa5   :  { %v143_v63 = vmax.f32 %v124_v60, 0.0  ;;  %v221_v0 = vmax.f32 %v202_v61, 0.0  ;;  %v349_v60 = vld [vmem:[%s2956_s0 + $0xb8] sm:$0xff]  ;;  %v492_v61 = vld [vmem:[%s2956_s0 + $0x108] sm:$0xff] }
  0xa7   :  { %v228_v1 = vpack.c.bf16 %v221_v0, %v220_v62  ;;  %v150_v2 = vpack.c.bf16 %v143_v63, %v142_v59  ;;  %v348_v59 = vld [vmem:[%s2956_s0 + $0xb0] sm:$0xff] }
  0xa8   :  { %v493_v62 = vld [vmem:[%s2956_s0 + $0x110] sm:$0xff]  ;;  %v355_v63 = vpack.c.bf16 %v349_v60, %v348_v59  ;;  %v2118_v60 = vld [vmem:[%s2958_s4 + $0x18] sm:$0xff] }
  0xa9   :  { %1847 = vmatmul.msk.bf16.gmra.mxu2 %vm241_vm3, %v228_v1  ;;  %1856 = vmatmul.msk.bf16.gmra.mxu3 %vm241_vm3, %v150_v2  ;;  %v498_v0 = vpack.c.bf16 %v493_v62, %v492_v61  ;;  %v2117_v1 = vld [vmem:[%s2958_s4 + $0x10] sm:$0xff]  ;;  %v350_v2 = vld [vmem:[%s2956_s0 + $0xc0] sm:$0xff] }
  0xaa   :  { %v126_v3 = vpop.f32.mrf.mxu0  ;;  %v204_v4 = vpop.f32.mrf.mxu1  ;;  %1878 = vmatmul.msk.bf16.gmra.mxu0 %vm84_vm2, %v497_v55  ;;  %451 = vmatpush.bf16.msrb.mxu3 %v2117_v1  ;;  %v634_v62 = vld [vmem:[%s2956_s0 + $0x150] sm:$0xff] }
  0xab   :  { %v127_v5 = vadd.f32 %v2333_v40, %v126_v3  ;;  %v205_v8 = vadd.f32 %v2333_v40, %v204_v4  ;;  %v351_v3 = vld [vmem:[%s2956_s0 + $0xc8] sm:$0xff]  ;;  %v494_v4 = vld [vmem:[%s2956_s0 + $0x118] sm:$0xff]  ;;  %593 = vmatpush.bf16.msrb.mxu1 %v2118_v60 }
  0xad   :  { %v144_v11 = vmax.f32 %v127_v5, 0.0  ;;  %v222_v14 = vmax.f32 %v205_v8, 0.0  ;;  %v356_v5 = vpack.c.bf16 %v351_v3, %v350_v2  ;;  %v499_v8 = vpack.c.bf16 %v494_v4, %v494_v4  ;;  %v778_v2 = vld [vmem:[%s2956_s0 + $0x1a8] sm:$0xff] }
  0xae   :  { %735 = vmatpush.bf16.msra.mxu3 %v2119_v53 }
  0xb2   :  { %v128_v9 = vpop.f32.mrf.mxu0  ;;  %v206_v10 = vpop.f32.mrf.mxu1 }
  0xb3   :  { %v129_v12 = vadd.f32 %v2333_v40, %v128_v9  ;;  %v207_v13 = vadd.f32 %v2333_v40, %v206_v10 }
  0xb5   :  { %v145_v15 = vmax.f32 %v129_v12, 0.0  ;;  %v223_v16 = vmax.f32 %v207_v13, 0.0  ;;  %v352_v12 = vld [vmem:[%s2956_s0 + $0xd0] sm:$0xff] }
  0xb7   :  { %v229_v17 = vpack.c.bf16 %v223_v16, %v222_v14  ;;  %v151_v18 = vpack.c.bf16 %v145_v15, %v144_v11  ;;  %v770_v15 = vld [vmem:[%s2956_s0 + $0x168] sm:$0xff]  ;;  %v771_v16 = vld [vmem:[%s2956_s0 + $0x170] sm:$0xff] }
  0xb9   :  { %1848 = vmatmul.msk.bf16.gmra.mxu2 %vm241_vm3, %v229_v17  ;;  %1857 = vmatmul.msk.bf16.gmra.mxu3 %vm241_vm3, %v151_v18  ;;  %v357_v17 = vpack.c.bf16 %v352_v12, %v352_v12  ;;  %v779_v18 = vpack.c.bf16 %v771_v16, %v770_v15 }
  0xba   :  { %v131_v19 = vpop.f32.mrf.mxu0  ;;  %v209_v20 = vpop.f32.mrf.mxu1  ;;  %1879 = vmatmul.msk.bf16.gmra.mxu0 %vm84_vm2, %v498_v0 }
  0xbb   :  { %v132_v21 = vadd.f32 %v2333_v40, %v131_v19  ;;  %v210_v22 = vadd.f32 %v2333_v40, %v209_v20 }
  0xbd   :  { %v146_v25 = vmax.f32 %v132_v21, 0.0  ;;  %v224_v28 = vmax.f32 %v210_v22, 0.0  ;;  %v628_v22 = vld [vmem:[%s2956_s0 + $0x120] sm:$0xff] }
  0xc2   :  { %v133_v23 = vpop.f32.mrf.mxu0  ;;  %v211_v24 = vpop.f32.mrf.mxu1 }
  0xc3   :  { %v134_v26 = vadd.f32 %v2333_v40, %v133_v23  ;;  %v212_v27 = vadd.f32 %v2333_v40, %v211_v24  ;;  %v629_v23 = vld [vmem:[%s2956_s0 + $0x128] sm:$0xff] }
  0xc5   :  { %v147_v29 = vmax.f32 %v134_v26, 0.0  ;;  %v225_v30 = vmax.f32 %v212_v27, 0.0  ;;  %v772_v26 = vld [vmem:[%s2956_s0 + $0x178] sm:$0xff]  ;;  %v773_v27 = vld [vmem:[%s2956_s0 + $0x180] sm:$0xff] }
  0xc7   :  { %v230_v31 = vpack.c.bf16 %v225_v30, %v224_v28  ;;  %v152_v32 = vpack.c.bf16 %v147_v29, %v146_v25  ;;  %v637_v28 = vpack.c.bf16 %v629_v23, %v628_v22  ;;  %v780_v29 = vpack.c.bf16 %v773_v27, %v772_v26  ;;  %v1054_v23 = vld [vmem:[%s2956_s0 + $0x1f8] sm:$0xff]  ;;  %v1055_v26 = vld [vmem:[%s2956_s0 + $0x200] sm:$0xff] }
  0xc9   :  { %1849 = vmatmul.msk.bf16.gmra.mxu2 %vm241_vm3, %v230_v31  ;;  %1858 = vmatmul.msk.bf16.gmra.mxu3 %vm241_vm3, %v152_v32 }
  0xca   :  { %v214_v35 = vpop.f32.mrf.mxu1  ;;  %v136_v36 = vpop.f32.mrf.mxu0  ;;  %1880 = vmatmul.msk.bf16.gmra.mxu0 %vm84_vm2, %v499_v8  ;;  %v783_v8 = vpack.c.bf16 %v778_v2, %v778_v2  ;;  %v914_v2 = vld [vmem:[%s2956_s0 + $0x1c0] sm:$0xff] }
  0xcb   :  { %v215_v38 = vadd.f32 %v2333_v40, %v214_v35  ;;  %v137_v39 = vadd.f32 %v2333_v40, %v136_v36 }
  0xcd   :  { %v226_v41 = vmax.f32 %v215_v38, 0.0  ;;  %v148_v42 = vmax.f32 %v137_v39, 0.0 }
  0xcf   :  { %v231_v45 = vpack.c.bf16 %v226_v41, %v226_v41  ;;  %v153_v46 = vpack.c.bf16 %v148_v42, %v148_v42 }
  0xd2   :  { %v216_v43 = vpop.f32.mrf.mxu1  ;;  %v138_v44 = vpop.f32.mrf.mxu0 }
  0xd3   :  { %v632_v43 = vld [vmem:[%s2956_s0 + $0x140] sm:$0xff]  ;;  %v633_v44 = vld [vmem:[%s2956_s0 + $0x148] sm:$0xff] }
  0xd4   :  { %v639_v49 = vpack.c.bf16 %v633_v44, %v632_v43  ;;  %v912_v43 = vld [vmem:[%s2956_s0 + $0x1b0] sm:$0xff]  ;;  %v913_v44 = vld [vmem:[%s2956_s0 + $0x1b8] sm:$0xff] }
  0xd5   :  { %v921_v53 = vpack.c.bf16 %v913_v44, %v912_v43 }
  0xd9   :  { %1850 = vmatmul.msk.bf16.gmra.mxu2 %vm241_vm3, %v231_v45  ;;  %1859 = vmatmul.msk.bf16.gmra.mxu3 %vm241_vm3, %v153_v46 }
  0xda   :  { %1908 = vmatmul.msk.bf16.vlgmr.msra.gmra.mxu0 %vm84_vm2, %v779_v18  ;;  %v524_v50 = vpop.f32.mrf.mxu0  ;;  %v636_v18 = vld [vmem:[%s2956_s0 + $0x160] sm:$0xff] }
  0xe2   :  { %v526_v57 = vpop.f32.mrf.mxu0 }
  0xe3   :  { %v527_v59 = vadd.f32 %v2333_v40, %v526_v57 }
  0xe5   :  { %v549_v61 = vmax.f32 %v527_v59, 0.0 }
  0xe9   :  { %1860 = vmatmul.msk.bf16.vlgmr.msrb.gmra.mxu2 %vm84_vm2, %v353_v52  ;;  %v525_v52 = vadd.f32 %v2333_v40, %v524_v50  ;;  %v1056_v50 = vld [vmem:[%s2956_s0 + $0x208] sm:$0xff] }
  0xea   :  { %947 = vmatpush.bf16.msrb.mxu2 %v2243_v6  ;;  %1909 = vmatmul.msk.bf16.gmra.mxu0 %vm84_vm2, %v780_v29 }
  0xee   :  { %948 = vmatpush.bf16.msrb.mxu2 %v2248_v7 }
  0xf9   :  { %1861 = vmatmul.msk.bf16.gmra.mxu2 %vm84_vm2, %v354_v58  ;;  %v548_v58 = vmax.f32 %v525_v52, 0.0 }
  0xfb   :  { %v557_v0 = vpack.c.bf16 %v549_v61, %v548_v58 }
  0xfd   :  { %1887 = vmatmul.msk.bf16.vlgmr.msrb.gmra.mxu1 %vm241_vm3, %v557_v0 }
 0x109   :  { %1862 = vmatmul.msk.bf16.gmra.mxu2 %vm84_vm2, %v355_v63  ;;  %v635_v63 = vld [vmem:[%s2956_s0 + $0x158] sm:$0xff] }
 0x10a   :  { %v640_v4 = vpack.c.bf16 %v635_v63, %v634_v62 }
 0x119   :  { %1863 = vmatmul.msk.bf16.gmra.mxu2 %vm84_vm2, %v356_v5  ;;  %v529_v5 = vpop.f32.mrf.mxu0 }
 0x11c   :  { %v266_v9 = vpop.f32.mrf.mxu2  ;;  %v320_v10 = vpop.f32.mrf.mxu3 }
 0x11d   :  { %v2432_v11 = vadd.f32 %v320_v10, %v266_v9  ;;  %v530_v9 = vadd.f32 %v2333_v40, %v529_v5 }
 0x11f   :  { %v550_v15 = vmax.f32 %v530_v9, 0.0  ;;  %v1058_v9 = vld [vmem:[%s2956_s0 + $0x218] sm:$0xff] }
 0x121   :  { %v531_v12 = vpop.f32.mrf.mxu0 }
 0x122   :  { %v532_v16 = vadd.f32 %v2333_v40, %v531_v12 }
 0x124   :  { %v2437_v13 = vpop.f32.mrf.mxu2  ;;  %v2439_v14 = vpop.f32.mrf.mxu3 }
 0x129   :  { %1864 = vmatmul.msk.bf16.gmra.mxu2 %vm84_vm2, %v357_v17  ;;  %v551_v17 = vmax.f32 %v532_v16, 0.0  ;;  %v534_v29 = vpop.f32.mrf.mxu0 }
 0x12c   :  { %v271_v19 = vpop.f32.mrf.mxu2  ;;  %v325_v20 = vpop.f32.mrf.mxu3 }
 0x12d   :  { %v2449_v21 = vadd.f32 %v325_v20, %v271_v19  ;;  %v558_v19 = vpack.c.bf16 %v551_v17, %v550_v15 }
 0x12f   :  { %1888 = vmatmul.msk.bf16.gmra.mxu1 %vm241_vm3, %v558_v19 }
 0x134   :  { %v2457_v24 = vpop.f32.mrf.mxu2  ;;  %v2459_v25 = vpop.f32.mrf.mxu3 }
 0x139   :  { %1892 = vmatmul.msk.bf16.vlgmr.msra.gmra.mxu2 %vm84_vm2, %v637_v28  ;;  %v641_v28 = vpack.c.bf16 %v636_v18, %v636_v18 }
 0x13a   :  { %1231 = vmatpush.bf16.msra.mxu2 %v2243_v6  ;;  %v774_v6 = vld [vmem:[%s2956_s0 + $0x188] sm:$0xff] }
 0x13c   :  { %v276_v30 = vpop.f32.mrf.mxu2  ;;  %v330_v31 = vpop.f32.mrf.mxu3 }
 0x13d   :  { %v2470_v32 = vadd.f32 %v330_v31, %v276_v30  ;;  %v1063_v30 = vpack.c.bf16 %v1055_v26, %v1054_v23 }
 0x13e   :  { %1232 = vmatpush.bf16.msra.mxu2 %v2248_v7  ;;  %v775_v7 = vld [vmem:[%s2956_s0 + $0x190] sm:$0xff] }
 0x13f   :  { %v781_v38 = vpack.c.bf16 %v775_v7, %v774_v6  ;;  %v535_v6 = vadd.f32 %v2333_v40, %v534_v29  ;;  %v916_v29 = vld [vmem:[%s2956_s0 + $0x1d0] sm:$0xff] }
 0x141   :  { %1910 = vmatmul.msk.bf16.gmra.mxu0 %vm84_vm2, %v781_v38  ;;  %v552_v38 = vmax.f32 %v535_v6, 0.0  ;;  %v1061_v6 = vld [vmem:[%s2956_s0 + $0x230] sm:$0xff] }
 0x144   :  { %v2479_v35 = vpop.f32.mrf.mxu2  ;;  %v2481_v36 = vpop.f32.mrf.mxu3 }
 0x149   :  { %1893 = vmatmul.msk.bf16.gmra.mxu2 %vm84_vm2, %v638_v37  ;;  %v536_v37 = vpop.f32.mrf.mxu0 }
 0x14c   :  { %v281_v39 = vpop.f32.mrf.mxu2  ;;  %v335_v41 = vpop.f32.mrf.mxu3 }
 0x14d   :  { %v2491_v42 = vadd.f32 %v335_v41, %v281_v39  ;;  %v537_v39 = vadd.f32 %v2333_v40, %v536_v37 }
 0x14f   :  { %v553_v41 = vmax.f32 %v537_v39, 0.0 }
 0x151   :  { %1911 = vmatmul.msk.bf16.gmra.mxu0 %vm84_vm2, %v782_v51  ;;  %v559_v47 = vpack.c.bf16 %v553_v41, %v552_v38  ;;  %v1057_v51 = vld [vmem:[%s2956_s0 + $0x210] sm:$0xff] }
 0x153   :  { %1889 = vmatmul.msk.bf16.gmra.mxu1 %vm241_vm3, %v559_v47 }
 0x154   :  { %v2499_v45 = vpop.f32.mrf.mxu2  ;;  %v2501_v46 = vpop.f32.mrf.mxu3 }
 0x159   :  { %1894 = vmatmul.msk.bf16.gmra.mxu2 %vm84_vm2, %v639_v49 }
 0x15c   :  { %v286_v54 = vpop.f32.mrf.mxu2  ;;  %v340_v55 = vpop.f32.mrf.mxu3 }
 0x15d   :  { %v2515_v56 = vadd.f32 %v340_v55, %v286_v54  ;;  %v539_v54 = vpop.f32.mrf.mxu0  ;;  %v1064_v55 = vpack.c.bf16 %v1057_v51, %v1056_v50 }
 0x15e   :  { %v540_v60 = vadd.f32 %v2333_v40, %v539_v54 }
 0x160   :  { %v554_v63 = vmax.f32 %v540_v60, 0.0 }
 0x161   :  { %1912 = vmatmul.msk.bf16.gmra.mxu0 %vm84_vm2, %v783_v8 }
 0x164   :  { %v288_v1 = vpop.f32.mrf.mxu2  ;;  %v342_v3 = vpop.f32.mrf.mxu3 }
 0x165   :  { %v541_v62 = vpop.f32.mrf.mxu0  ;;  %v915_v3 = vld [vmem:[%s2956_s0 + $0x1c8] sm:$0xff] }
 0x166   :  { %v542_v0 = vadd.f32 %v2333_v40, %v541_v62  ;;  %v922_v15 = vpack.c.bf16 %v915_v3, %v914_v2  ;;  %v1062_v3 = vld [vmem:[%s2956_s0 + $0x238] sm:$0xff] }
 0x168   :  { %v555_v1 = vmax.f32 %v542_v0, 0.0 }
 0x169   :  { %1895 = vmatmul.msk.bf16.gmra.mxu2 %vm84_vm2, %v640_v4 }
 0x16a   :  { %v560_v4 = vpack.c.bf16 %v555_v1, %v554_v63 }
 0x16c   :  { %v382_v10 = vpop.f32.mrf.mxu2  ;;  %1890 = vmatmul.msk.bf16.gmra.mxu1 %vm241_vm3, %v560_v4 }
 0x16d   :  { %v383_v20 = vadd.f32 %v2333_v40, %v382_v10  ;;  %v1059_v10 = vld [vmem:[%s2956_s0 + $0x220] sm:$0xff]  ;;  %v544_v16 = vpop.f32.mrf.mxu0 }
 0x16e   :  { %v1065_v17 = vpack.c.bf16 %v1059_v10, %v1058_v9 }
 0x16f   :  { %v406_v31 = vmax.f32 %v383_v20, 0.0  ;;  %v545_v20 = vadd.f32 %v2333_v40, %v544_v16 }
 0x171   :  { %1940 = vmatmul.msk.bf16.vlgmr.msrb.gmra.mxu0 %vm84_vm2, %v1063_v30  ;;  %v556_v26 = vmax.f32 %v545_v20, 0.0  ;;  %v917_v30 = vld [vmem:[%s2956_s0 + $0x1d8] sm:$0xff] }
 0x172   :  { %v923_v37 = vpack.c.bf16 %v917_v30, %v916_v29 }
 0x174   :  { %v384_v22 = vpop.f32.mrf.mxu2 }
 0x175   :  { %v385_v27 = vadd.f32 %v2333_v40, %v384_v22 }
 0x177   :  { %v407_v33 = vmax.f32 %v385_v27, 0.0  ;;  %v546_v27 = vpop.f32.mrf.mxu0 }
 0x179   :  { %v415_v34 = vpack.c.bf16 %v407_v33, %v406_v31  ;;  %1896 = vmatmul.msk.bf16.gmra.mxu2 %vm84_vm2, %v641_v28  ;;  %v561_v28 = vpack.c.bf16 %v556_v26, %v556_v26 }
 0x17b   :  { %1871 = vmatmul.msk.bf16.vlgmr.msrb.gmra.mxu3 %vm241_vm3, %v415_v34  ;;  %v1060_v34 = vld [vmem:[%s2956_s0 + $0x228] sm:$0xff] }
 0x17c   :  { %v387_v7 = vpop.f32.mrf.mxu2  ;;  %1891 = vmatmul.msk.bf16.gmra.mxu1 %vm241_vm3, %v561_v28  ;;  %v1066_v39 = vpack.c.bf16 %v1061_v6, %v1060_v34  ;;  %v1196_v34 = vld [vmem:[%s2956_s0 + $0x240] sm:$0xff]  ;;  %v1197_v6 = vld [vmem:[%s2956_s0 + $0x248] sm:$0xff] }
 0x17d   :  { %v388_v48 = vadd.f32 %v2333_v40, %v387_v7 }
 0x17f   :  { %v408_v57 = vmax.f32 %v388_v48, 0.0  ;;  %v808_v38 = vpop.f32.mrf.mxu0  ;;  %v2121_v48 = vld [vmem:[%s2958_s4 + $0x30] sm:$0xff] }
 0x180   :  { %v809_v47 = vadd.f32 %v2333_v40, %v808_v38  ;;  %1019 = vmatpush.bf16.msrb.mxu3 %v2121_v48 }
 0x181   :  { %1941 = vmatmul.msk.bf16.gmra.mxu0 %vm84_vm2, %v1064_v55 }
 0x182   :  { %v832_v51 = vmax.f32 %v809_v47, 0.0 }
 0x184   :  { %v389_v49 = vpop.f32.mrf.mxu2 }
 0x185   :  { %v390_v52 = vadd.f32 %v2333_v40, %v389_v49 }
 0x187   :  { %v409_v58 = vmax.f32 %v390_v52, 0.0  ;;  %v810_v50 = vpop.f32.mrf.mxu0 }
 0x188   :  { %v811_v52 = vadd.f32 %v2333_v40, %v810_v50 }
 0x189   :  { %1924 = vmatmul.msk.bf16.vlgmr.msrb.gmra.mxu2 %vm84_vm2, %v921_v53  ;;  %v416_v59 = vpack.c.bf16 %v409_v58, %v408_v57  ;;  %v2120_v53 = vld [vmem:[%s2958_s4 + $0x28] sm:$0xff]  ;;  %v918_v57 = vld [vmem:[%s2956_s0 + $0x1e0] sm:$0xff] }
 0x18a   :  { %v833_v54 = vmax.f32 %v811_v52, 0.0  ;;  %877 = vmatpush.bf16.msra.mxu1 %v2120_v53  ;;  %v919_v58 = vld [vmem:[%s2956_s0 + $0x1e8] sm:$0xff] }
 0x18b   :  { %1872 = vmatmul.msk.bf16.gmra.mxu3 %vm241_vm3, %v416_v59  ;;  %v924_v62 = vpack.c.bf16 %v919_v58, %v918_v57  ;;  %v1198_v57 = vld [vmem:[%s2956_s0 + $0x250] sm:$0xff]  ;;  %v1199_v58 = vld [vmem:[%s2956_s0 + $0x258] sm:$0xff] }
 0x18c   :  { %v392_v61 = vpop.f32.mrf.mxu2  ;;  %v841_v59 = vpack.c.bf16 %v833_v54, %v832_v51 }
 0x18d   :  { %v393_v5 = vadd.f32 %v2333_v40, %v392_v61 }
 0x18e   :  { %1919 = vmatmul.msk.bf16.vlgmr.msra.gmra.mxu1 %vm241_vm3, %v841_v59 }
 0x18f   :  { %v410_v18 = vmax.f32 %v393_v5, 0.0  ;;  %v813_v63 = vpop.f32.mrf.mxu0  ;;  %v1067_v5 = vpack.c.bf16 %v1062_v3, %v1062_v3 }
 0x190   :  { %v814_v1 = vadd.f32 %v2333_v40, %v813_v63  ;;  %v1206_v63 = vpack.c.bf16 %v1199_v58, %v1198_v57 }
 0x191   :  { %1942 = vmatmul.msk.bf16.gmra.mxu0 %vm84_vm2, %v1065_v17 }
 0x194   :  { %v394_v8 = vpop.f32.mrf.mxu2 }
 0x195   :  { %v395_v12 = vadd.f32 %v2333_v40, %v394_v8  ;;  %v834_v8 = vmax.f32 %v814_v1, 0.0 }
 0x197   :  { %v411_v19 = vmax.f32 %v395_v12, 0.0  ;;  %v815_v4 = vpop.f32.mrf.mxu0  ;;  %v920_v12 = vld [vmem:[%s2956_s0 + $0x1f0] sm:$0xff] }
 0x198   :  { %v816_v9 = vadd.f32 %v2333_v40, %v815_v4 }
 0x199   :  { %1925 = vmatmul.msk.bf16.gmra.mxu2 %vm84_vm2, %v922_v15  ;;  %v417_v22 = vpack.c.bf16 %v411_v19, %v410_v18  ;;  %v925_v19 = vpack.c.bf16 %v920_v12, %v920_v12 }
 0x19a   :  { %v835_v10 = vmax.f32 %v816_v9, 0.0 }
 0x19b   :  { %1873 = vmatmul.msk.bf16.gmra.mxu3 %vm241_vm3, %v417_v22 }
 0x19c   :  { %v397_v23 = vpop.f32.mrf.mxu2  ;;  %v842_v15 = vpack.c.bf16 %v835_v10, %v834_v8 }
 0x19d   :  { %v398_v31 = vadd.f32 %v2333_v40, %v397_v23 }
 0x19e   :  { %1920 = vmatmul.msk.bf16.gmra.mxu1 %vm241_vm3, %v842_v15 }
 0x19f   :  { %v412_v41 = vmax.f32 %v398_v31, 0.0 }
 0x1a1   :  { %1943 = vmatmul.msk.bf16.gmra.mxu0 %vm84_vm2, %v1066_v39 }
 0x1a4   :  { %v399_v33 = vpop.f32.mrf.mxu2 }
 0x1a5   :  { %v400_v7 = vadd.f32 %v2333_v40, %v399_v33 }
 0x1a7   :  { %v413_v43 = vmax.f32 %v400_v7, 0.0 }
 0x1a9   :  { %1926 = vmatmul.msk.bf16.gmra.mxu2 %vm84_vm2, %v923_v37  ;;  %v418_v44 = vpack.c.bf16 %v413_v43, %v412_v41  ;;  %v1205_v41 = vpack.c.bf16 %v1197_v6, %v1196_v34 }
 0x1ab   :  { %1874 = vmatmul.msk.bf16.gmra.mxu3 %vm241_vm3, %v418_v44 }
 0x1ac   :  { %v402_v49 = vpop.f32.mrf.mxu2 }
 0x1ad   :  { %v403_v55 = vadd.f32 %v2333_v40, %v402_v49 }
 0x1af   :  { %v414_v61 = vmax.f32 %v403_v55, 0.0  ;;  %v595_v55 = vpop.f32.mrf.mxu1 }
 0x1b1   :  { %v419_v0 = vpack.c.bf16 %v414_v61, %v414_v61  ;;  %1944 = vmatmul.msk.bf16.gmra.mxu0 %vm84_vm2, %v1067_v5 }
 0x1b4   :  { %v404_v60 = vpop.f32.mrf.mxu2 }
 0x1b7   :  { %v597_v5 = vpop.f32.mrf.mxu1 }
 0x1b9   :  { %1927 = vmatmul.msk.bf16.gmra.mxu2 %vm84_vm2, %v924_v62 }
 0x1bb   :  { %1875 = vmatmul.msk.bf16.gmra.mxu3 %vm241_vm3, %v419_v0 }
 0x1bc   :  { %v666_v2 = vpop.f32.mrf.mxu2 }
 0x1bd   :  { %v667_v16 = vadd.f32 %v2333_v40, %v666_v2 }
 0x1be   :  { %v818_v20 = vpop.f32.mrf.mxu0 }
 0x1bf   :  { %v690_v22 = vmax.f32 %v667_v16, 0.0  ;;  %v819_v27 = vadd.f32 %v2333_v40, %v818_v20  ;;  %v600_v15 = vpop.f32.mrf.mxu1  ;;  %v1200_v16 = vld [vmem:[%s2956_s0 + $0x260] sm:$0xff] }
 0x1c1   :  { %v836_v30 = vmax.f32 %v819_v27, 0.0 }
 0x1c4   :  { %v668_v17 = vpop.f32.mrf.mxu2 }
 0x1c5   :  { %v669_v18 = vadd.f32 %v2333_v40, %v668_v17  ;;  %v1201_v17 = vld [vmem:[%s2956_s0 + $0x268] sm:$0xff] }
 0x1c6   :  { %v820_v29 = vpop.f32.mrf.mxu0 }
 0x1c7   :  { %v691_v23 = vmax.f32 %v669_v18, 0.0  ;;  %v821_v31 = vadd.f32 %v2333_v40, %v820_v29  ;;  %v602_v29 = vpop.f32.mrf.mxu1 }
 0x1c9   :  { %v699_v26 = vpack.c.bf16 %v691_v23, %v690_v22  ;;  %1928 = vmatmul.msk.bf16.gmra.mxu2 %vm84_vm2, %v925_v19  ;;  %v837_v33 = vmax.f32 %v821_v31, 0.0  ;;  %v1207_v22 = vpack.c.bf16 %v1201_v17, %v1200_v16  ;;  %v2123_v31 = vld [vmem:[%s2958_s4 + $0x40] sm:$0xff] }
 0x1cb   :  { %1903 = vmatmul.msk.bf16.vlgmr.msra.gmra.mxu3 %vm241_vm3, %v699_v26  ;;  %v843_v7 = vpack.c.bf16 %v837_v33, %v836_v30 }
 0x1cc   :  { %v671_v28 = vpop.f32.mrf.mxu2  ;;  %1303 = vmatpush.bf16.msra.mxu3 %v2123_v31 }
 0x1cd   :  { %v672_v37 = vadd.f32 %v2333_v40, %v671_v28  ;;  %1921 = vmatmul.msk.bf16.gmra.mxu1 %vm241_vm3, %v843_v7 }
 0x1ce   :  { %v823_v43 = vpop.f32.mrf.mxu0 }
 0x1cf   :  { %v692_v44 = vmax.f32 %v672_v37, 0.0  ;;  %v824_v49 = vadd.f32 %v2333_v40, %v823_v43 }
 0x1d1   :  { %v838_v52 = vmax.f32 %v824_v49, 0.0  ;;  %v1203_v49 = vld [vmem:[%s2956_s0 + $0x278] sm:$0xff] }
 0x1d4   :  { %v673_v38 = vpop.f32.mrf.mxu2 }
 0x1d5   :  { %v674_v39 = vadd.f32 %v2333_v40, %v673_v38  ;;  %v2122_v38 = vld [vmem:[%s2958_s4 + $0x38] sm:$0xff] }
 0x1d6   :  { %v825_v51 = vpop.f32.mrf.mxu0  ;;  %1161 = vmatpush.bf16.msrb.mxu1 %v2122_v38 }
 0x1d7   :  { %v693_v47 = vmax.f32 %v674_v39, 0.0  ;;  %v826_v53 = vadd.f32 %v2333_v40, %v825_v51 }
 0x1d9   :  { %1956 = vmatmul.msk.bf16.vlgmr.msra.gmra.mxu2 %vm84_vm2, %v1205_v41  ;;  %v700_v48 = vpack.c.bf16 %v693_v47, %v692_v44  ;;  %v839_v54 = vmax.f32 %v826_v53, 0.0  ;;  %v605_v47 = vpop.f32.mrf.mxu1 }
 0x1db   :  { %1904 = vmatmul.msk.bf16.gmra.mxu3 %vm241_vm3, %v700_v48  ;;  %v844_v59 = vpack.c.bf16 %v839_v54, %v838_v52  ;;  %v1202_v48 = vld [vmem:[%s2956_s0 + $0x270] sm:$0xff] }
 0x1dc   :  { %v676_v50 = vpop.f32.mrf.mxu2  ;;  %v1208_v53 = vpack.c.bf16 %v1203_v49, %v1202_v48 }
 0x1dd   :  { %v677_v60 = vadd.f32 %v2333_v40, %v676_v50  ;;  %1922 = vmatmul.msk.bf16.gmra.mxu1 %vm241_vm3, %v844_v59 }
 0x1de   :  { %v828_v0 = vpop.f32.mrf.mxu0 }
 0x1df   :  { %v694_v1 = vmax.f32 %v677_v60, 0.0  ;;  %v829_v3 = vadd.f32 %v2333_v40, %v828_v0 }
 0x1e1   :  { %v840_v9 = vmax.f32 %v829_v3, 0.0  ;;  %v607_v60 = vpop.f32.mrf.mxu1 }
 0x1e3   :  { %v845_v12 = vpack.c.bf16 %v840_v9, %v840_v9 }
 0x1e4   :  { %v678_v61 = vpop.f32.mrf.mxu2 }
 0x1e5   :  { %v679_v62 = vadd.f32 %v2333_v40, %v678_v61 }
 0x1e6   :  { %v830_v10 = vpop.f32.mrf.mxu0 }
 0x1e7   :  { %v695_v2 = vmax.f32 %v679_v62, 0.0 }
 0x1e9   :  { %v701_v4 = vpack.c.bf16 %v695_v2, %v694_v1  ;;  %1957 = vmatmul.msk.bf16.gmra.mxu2 %vm84_vm2, %v1206_v63 }
 0x1eb   :  { %1905 = vmatmul.msk.bf16.gmra.mxu3 %vm241_vm3, %v701_v4  ;;  %v610_v4 = vpop.f32.mrf.mxu1 }
 0x1ec   :  { %v681_v8 = vpop.f32.mrf.mxu2 }
 0x1ed   :  { %v682_v18 = vadd.f32 %v2333_v40, %v681_v8  ;;  %1923 = vmatmul.msk.bf16.gmra.mxu1 %vm241_vm3, %v845_v12  ;;  %v328_v12 = vadd.f32 %v2459_v25, %v2457_v24 }
 0x1ee   :  { %v1092_v23 = vpop.f32.mrf.mxu0 }
 0x1ef   :  { %v696_v26 = vmax.f32 %v682_v18, 0.0  ;;  %v1093_v30 = vadd.f32 %v2333_v40, %v1092_v23 }
 0x1f1   :  { %v1116_v7 = vmax.f32 %v1093_v30, 0.0 }
 0x1f4   :  { %v683_v19 = vpop.f32.mrf.mxu2 }
 0x1f5   :  { %v684_v20 = vadd.f32 %v2333_v40, %v683_v19 }
 0x1f6   :  { %v1094_v34 = vpop.f32.mrf.mxu0 }
 0x1f7   :  { %v697_v27 = vmax.f32 %v684_v20, 0.0  ;;  %v1095_v37 = vadd.f32 %v2333_v40, %v1094_v34 }
 0x1f9   :  { %v702_v28 = vpack.c.bf16 %v697_v27, %v696_v26  ;;  %1958 = vmatmul.msk.bf16.gmra.mxu2 %vm84_vm2, %v1207_v22  ;;  %v1117_v41 = vmax.f32 %v1095_v37, 0.0  ;;  %v2720_v26 = vpop.f32.mrf.mxu1 }
 0x1fb   :  { %1906 = vmatmul.msk.bf16.gmra.mxu3 %vm241_vm3, %v702_v28  ;;  %v1125_v50 = vpack.c.bf16 %v1117_v41, %v1116_v7 }
 0x1fc   :  { %v686_v33 = vpop.f32.mrf.mxu2 }
 0x1fd   :  { %v687_v43 = vadd.f32 %v2333_v40, %v686_v33  ;;  %1951 = vmatmul.msk.bf16.vlgmr.msrb.gmra.mxu1 %vm241_vm3, %v1125_v50 }
 0x1fe   :  { %v453_v6 = vpop.f32.mrf.mxu3  ;;  %v1097_v54 = vpop.f32.mrf.mxu0 }
 0x1ff   :  { %v477_v39 = vadd.f32 %v453_v6, %v2432_v11  ;;  %v323_v11 = vadd.f32 %v2439_v14, %v2437_v13  ;;  %v698_v52 = vmax.f32 %v687_v43, 0.0  ;;  %v1098_v61 = vadd.f32 %v2333_v40, %v1097_v54 }
 0x201   :  { %v2689_v44 = vadd.f32 %v595_v55, %v477_v39  ;;  %v703_v58 = vpack.c.bf16 %v698_v52, %v698_v52  ;;  %v1118_v1 = vmax.f32 %v1098_v61, 0.0  ;;  %v333_v39 = vadd.f32 %v2481_v36, %v2479_v35 }
 0x204   :  { %v688_v51 = vpop.f32.mrf.mxu2 }
 0x206   :  { %v455_v55 = vpop.f32.mrf.mxu3  ;;  %v1099_v63 = vpop.f32.mrf.mxu0 }
 0x207   :  { %v478_v57 = vadd.f32 %v455_v55, %v323_v11  ;;  %v1100_v13 = vadd.f32 %v2333_v40, %v1099_v63 }
 0x209   :  { %v2700_v59 = vadd.f32 %v597_v5, %v478_v57  ;;  %1959 = vmatmul.msk.bf16.gmra.mxu2 %vm84_vm2, %v1208_v53  ;;  %v1119_v2 = vmax.f32 %v1100_v13, 0.0  ;;  %v1204_v5 = vld [vmem:[%s2956_s0 + $0x280] sm:$0xff] }
 0x20b   :  { %1907 = vmatmul.msk.bf16.gmra.mxu3 %vm241_vm3, %v703_v58  ;;  %v1126_v8 = vpack.c.bf16 %v1119_v2, %v1118_v1  ;;  %v338_v1 = vadd.f32 %v2501_v46, %v2499_v45 }
 0x20c   :  { %v950_v62 = vpop.f32.mrf.mxu2 }
 0x20d   :  { %v951_v9 = vadd.f32 %v2333_v40, %v950_v62  ;;  %1952 = vmatmul.msk.bf16.gmra.mxu1 %vm241_vm3, %v1126_v8 }
 0x20e   :  { %v458_v0 = vpop.f32.mrf.mxu3  ;;  %v1102_v17 = vpop.f32.mrf.mxu0 }
 0x20f   :  { %v479_v14 = vadd.f32 %v458_v0, %v2449_v21  ;;  %v1209_v21 = vpack.c.bf16 %v1204_v5, %v1204_v5  ;;  %v974_v18 = vmax.f32 %v951_v9, 0.0  ;;  %v1103_v27 = vadd.f32 %v2333_v40, %v1102_v17 }
 0x211   :  { %v2707_v3 = vadd.f32 %v600_v15, %v479_v14  ;;  %v1120_v30 = vmax.f32 %v1103_v27, 0.0 }
 0x214   :  { %v952_v10 = vpop.f32.mrf.mxu2 }
 0x215   :  { %v953_v16 = vadd.f32 %v2333_v40, %v952_v10 }
 0x216   :  { %v460_v15 = vpop.f32.mrf.mxu3  ;;  %v1104_v25 = vpop.f32.mrf.mxu0 }
 0x217   :  { %v975_v19 = vmax.f32 %v953_v16, 0.0  ;;  %v480_v20 = vadd.f32 %v460_v15, %v328_v12  ;;  %v1105_v31 = vadd.f32 %v2333_v40, %v1104_v25 }
 0x219   :  { %v983_v22 = vpack.c.bf16 %v975_v19, %v974_v18  ;;  %v2717_v23 = vadd.f32 %v602_v29, %v480_v20  ;;  %1960 = vmatmul.msk.bf16.gmra.mxu2 %vm84_vm2, %v1209_v21  ;;  %v1121_v34 = vmax.f32 %v1105_v31, 0.0  ;;  %v615_v29 = vpop.f32.mrf.mxu1  ;;  %v2758_v18 = vld [vmem:[%s2957_s3] ss:$0 sm:$0xff] }
 0x21b   :  { %1935 = vmatmul.msk.bf16.vlgmr.msrb.gmra.mxu3 %vm241_vm3, %v983_v22  ;;  %v1127_v7 = vpack.c.bf16 %v1121_v34, %v1120_v30 }
 0x21c   :  { %v955_v24 = vpop.f32.mrf.mxu2 }
 0x21d   :  { %v956_v37 = vadd.f32 %v2333_v40, %v955_v24  ;;  %1953 = vmatmul.msk.bf16.gmra.mxu1 %vm241_vm3, %v1127_v7 }
 0x21e   :  { %v463_v28 = vpop.f32.mrf.mxu3  ;;  %v1107_v43 = vpop.f32.mrf.mxu0 }
 0x21f   :  { %v481_v33 = vadd.f32 %v463_v28, %v2470_v32  ;;  %v976_v49 = vmax.f32 %v956_v37, 0.0  ;;  %v1108_v52 = vadd.f32 %v2333_v40, %v1107_v43 }
 0x221   :  { %v2726_v6 = vadd.f32 %v605_v47, %v481_v33  ;;  %v617_v11 = vpop.f32.mrf.mxu1  ;;  %v1122_v57 = vmax.f32 %v1108_v52, 0.0 }
 0x224   :  { %v957_v38 = vpop.f32.mrf.mxu2 }
 0x225   :  { %v958_v41 = vadd.f32 %v2333_v40, %v957_v38 }
 0x226   :  { %v465_v48 = vpop.f32.mrf.mxu3  ;;  %v1109_v54 = vpop.f32.mrf.mxu0 }
 0x227   :  { %v977_v50 = vmax.f32 %v958_v41, 0.0  ;;  %v482_v32 = vadd.f32 %v465_v48, %v333_v39  ;;  %v1110_v35 = vadd.f32 %v2333_v40, %v1109_v54 }
 0x229   :  { %v984_v51 = vpack.c.bf16 %v977_v50, %v976_v49  ;;  %v2733_v47 = vadd.f32 %v607_v60, %v482_v32  ;;  %v1123_v58 = vmax.f32 %v1110_v35, 0.0  ;;  %v879_v62 = vpop.f32.mrf.mxu1 }
 0x22b   :  { %1936 = vmatmul.msk.bf16.gmra.mxu3 %vm241_vm3, %v984_v51  ;;  %v1128_v63 = vpack.c.bf16 %v1123_v58, %v1122_v57 }
 0x22c   :  { %v960_v53 = vpop.f32.mrf.mxu2 }
 0x22d   :  { %v961_v60 = vadd.f32 %v2333_v40, %v960_v53  ;;  %1954 = vmatmul.msk.bf16.gmra.mxu1 %vm241_vm3, %v1128_v63 }
 0x22e   :  { %v468_v55 = vpop.f32.mrf.mxu3  ;;  %v1112_v10 = vpop.f32.mrf.mxu0 }
 0x22f   :  { %v483_v36 = vadd.f32 %v468_v55, %v2491_v42  ;;  %v978_v2 = vmax.f32 %v961_v60, 0.0  ;;  %v1113_v12 = vadd.f32 %v2333_v40, %v1112_v10 }
 0x231   :  { %v2739_v61 = vadd.f32 %v610_v4, %v483_v36  ;;  %v2748_v4 = vpop.f32.mrf.mxu1  ;;  %v1124_v45 = vmax.f32 %v1113_v12, 0.0 }
 0x233   :  { %v1129_v17 = vpack.c.bf16 %v1124_v45, %v1124_v45 }
 0x234   :  { %v962_v0 = vpop.f32.mrf.mxu2 }
 0x235   :  { %v963_v13 = vadd.f32 %v2333_v40, %v962_v0 }
 0x236   :  { %v470_v14 = vpop.f32.mrf.mxu3  ;;  %v1114_v22 = vpop.f32.mrf.mxu0 }
 0x237   :  { %v979_v5 = vmax.f32 %v963_v13, 0.0  ;;  %v2746_v8 = vadd.f32 %v470_v14, %v338_v1 }
 0x239   :  { %v985_v42 = vpack.c.bf16 %v979_v5, %v978_v2  ;;  %v884_v15 = vpop.f32.mrf.mxu1 }
 0x23b   :  { %1937 = vmatmul.msk.bf16.gmra.mxu3 %vm241_vm3, %v985_v42 }
 0x23c   :  { %v965_v9 = vpop.f32.mrf.mxu2 }
 0x23d   :  { %v966_v19 = vadd.f32 %v2758_v18, %v965_v9  ;;  %1955 = vmatmul.msk.bf16.gmra.mxu1 %vm241_vm3, %v1129_v17 }
 0x23e   :  { %v473_v16 = vpop.f32.mrf.mxu3 }
 0x23f   :  { %v485_v21 = vadd.f32 %v473_v16, %v2515_v56  ;;  %v980_v56 = vmax.f32 %v966_v19, 0.0 }
 0x241   :  { %v2753_v46 = vadd.f32 %v615_v29, %v485_v21  ;;  %v2763_v28 = vpop.f32.mrf.mxu1 }
 0x244   :  { %v967_v20 = vpop.f32.mrf.mxu2 }
 0x245   :  { %v968_v40 = vadd.f32 %v2758_v18, %v967_v20 }
 0x246   :  { %v475_v27 = vpop.f32.mrf.mxu3 }
 0x247   :  { %v981_v24 = vmax.f32 %v968_v40, 0.0 }
 0x249   :  { %v986_v25 = vpack.c.bf16 %v981_v24, %v980_v56 }
 0x24a   :  { %v889_v7 = vpop.f32.mrf.mxu1 }
 0x24b   :  { %1938 = vmatmul.msk.bf16.gmra.mxu3 %vm241_vm3, %v986_v25 }
 0x24c   :  { %v970_v30 = vpop.f32.mrf.mxu2 }
 0x24d   :  { %v971_v34 = vadd.f32 %v2758_v18, %v970_v30 }
 0x24e   :  { %v737_v31 = vpop.f32.mrf.mxu3 }
 0x24f   :  { %v761_v33 = vadd.f32 %v737_v31, %v2689_v44  ;;  %v982_v38 = vmax.f32 %v971_v34, 0.0 }
 0x251   :  { %v2768_v29 = vadd.f32 %v879_v62, %v761_v33  ;;  %v987_v43 = vpack.c.bf16 %v982_v38, %v982_v38 }
 0x252   :  { %v2773_v48 = vpop.f32.mrf.mxu1 }
 0x254   :  { %v972_v37 = vpop.f32.mrf.mxu2 }
 0x256   :  { %v739_v39 = vpop.f32.mrf.mxu3 }
 0x257   :  { %v2771_v41 = vadd.f32 %v739_v39, %v2700_v59 }
 0x25a   :  { %v894_v51 = vpop.f32.mrf.mxu1 }
 0x25b   :  { %1939 = vmatmul.msk.bf16.gmra.mxu3 %vm241_vm3, %v987_v43 }
 0x25c   :  { %v1234_v49 = vpop.f32.mrf.mxu2 }
 0x25d   :  { %v1235_v11 = vadd.f32 %v2758_v18, %v1234_v49 }
 0x25e   :  { %v742_v50 = vpop.f32.mrf.mxu3 }
 0x25f   :  { %v763_v44 = vadd.f32 %v742_v50, %v2707_v3  ;;  %v1258_v59 = vmax.f32 %v1235_v11, 0.0 }
 0x261   :  { %v2777_v32 = vadd.f32 %v884_v15, %v763_v44  ;;  %v626_v15 = vadd.f32 %v2720_v26, %v2746_v8  ;;  %v2127_v26 = vld [vmem:[%s2960_s6 + $0x18] sm:$0xff] }
 0x262   :  { %v896_v36 = vpop.f32.mrf.mxu1  ;;  %1393 = vmatpush.bf16.msra.mxu0 %v2127_v26 }
 0x264   :  { %v1236_v52 = vpop.f32.mrf.mxu2 }
 0x265   :  { %v1237_v53 = vadd.f32 %v2758_v18, %v1236_v52 }
 0x266   :  { %v744_v54 = vpop.f32.mrf.mxu3 }
 0x267   :  { %v1259_v55 = vmax.f32 %v1237_v53, 0.0  ;;  %v2782_v57 = vadd.f32 %v744_v54, %v2717_v23 }
 0x269   :  { %v1267_v35 = vpack.c.bf16 %v1259_v55, %v1258_v59  ;;  %v904_v55 = vadd.f32 %v2748_v4, %v2771_v41  ;;  %v2126_v4 = vld [vmem:[%s2960_s6 + $0x10] sm:$0xff] }
 0x26a   :  { %v899_v0 = vpop.f32.mrf.mxu1  ;;  %1394 = vmatpush.bf16.msra.mxu0 %v2126_v4  ;;  %v2141_v4 = vld [vmem:[%s2960_s6 + $0x88] sm:$0xff] }
 0x26b   :  { %1967 = vmatmul.msk.bf16.vlgmr.msra.gmra.mxu3 %vm241_vm3, %v1267_v35 }
 0x26c   :  { %v1239_v58 = vpop.f32.mrf.mxu2 }
 0x26d   :  { %v1240_v63 = vadd.f32 %v2758_v18, %v1239_v58 }
 0x26e   :  { %v747_v3 = vpop.f32.mrf.mxu3 }
 0x26f   :  { %v765_v62 = vadd.f32 %v747_v3, %v2726_v6  ;;  %v1260_v13 = vmax.f32 %v1240_v63, 0.0 }
 0x271   :  { %v2787_v60 = vadd.f32 %v889_v7, %v765_v62 }
 0x272   :  { %v901_v9 = vpop.f32.mrf.mxu1 }
 0x274   :  { %v1241_v1 = vpop.f32.mrf.mxu2 }
 0x275   :  { %v1242_v14 = vadd.f32 %v2758_v18, %v1241_v1 }
 0x276   :  { %v749_v2 = vpop.f32.mrf.mxu3 }
 0x277   :  { %v1261_v23 = vmax.f32 %v1242_v14, 0.0  ;;  %v2791_v5 = vadd.f32 %v749_v2, %v2733_v47 }
 0x279   :  { %v1268_v42 = vpack.c.bf16 %v1261_v23, %v1260_v13 }
 0x27a   :  { %v1163_v45 = vpop.f32.mrf.mxu1 }
 0x27b   :  { %1968 = vmatmul.msk.bf16.gmra.mxu3 %vm241_vm3, %v1268_v42 }
 0x27c   :  { %v1244_v10 = vpop.f32.mrf.mxu2 }
 0x27d   :  { %v1245_v16 = vadd.f32 %v2758_v18, %v1244_v10  ;;  %v2124_v10 = vld [vmem:[%s2960_s6] sm:$0xff] }
 0x27e   :  { %v752_v6 = vpop.f32.mrf.mxu3 }
 0x27f   :  { %v767_v12 = vadd.f32 %v752_v6, %v2739_v61  ;;  %v1262_v19 = vmax.f32 %v1245_v16, 0.0 }
 0x281   :  { %v2796_v21 = vadd.f32 %v894_v51, %v767_v12 }
 0x282   :  { %v1165_v24 = vpop.f32.mrf.mxu1 }
 0x284   :  { %v1246_v17 = vpop.f32.mrf.mxu2 }
 0x285   :  { %v1247_v47 = vadd.f32 %v2758_v18, %v1246_v17 }
 0x286   :  { %v754_v20 = vpop.f32.mrf.mxu3 }
 0x287   :  { %v1263_v22 = vmax.f32 %v1247_v47, 0.0  ;;  %v768_v40 = vadd.f32 %v754_v20, %v626_v15 }
 0x289   :  { %v1269_v27 = vpack.c.bf16 %v1263_v22, %v1262_v19  ;;  %v2801_v56 = vadd.f32 %v896_v36, %v768_v40 }
 0x28a   :  { %v1168_v33 = vpop.f32.mrf.mxu1 }
 0x28b   :  { %1969 = vmatmul.msk.bf16.gmra.mxu3 %vm241_vm3, %v1269_v27  ;;  %v2128_v27 = vld [vmem:[%s2960_s6 + $0x20] sm:$0xff] }
 0x28c   :  { %v1249_v61 = vpop.f32.mrf.mxu2 }
 0x28d   :  { %v1250_v8 = vadd.f32 %v2758_v18, %v1249_v61 }
 0x28e   :  { %v757_v25 = vpop.f32.mrf.mxu3 }
 0x28f   :  { %v769_v30 = vadd.f32 %v757_v25, %v2753_v46  ;;  %v1264_v7 = vmax.f32 %v1250_v8, 0.0  ;;  %v2125_v46 = vld [vmem:[%s2960_s6 + $0x8] sm:$0xff] }
 0x290   :  { %1421 = vmatpush.bf16.msra.mxu1 %v2125_v46  ;;  %v2132_v46 = vld [vmem:[%s2960_s6 + $0x40] sm:$0xff] }
 0x291   :  { %v911_v31 = vadd.f32 %v899_v0, %v769_v30 }
 0x292   :  { %v1170_v49 = vpop.f32.mrf.mxu1 }
 0x294   :  { %v1251_v34 = vpop.f32.mrf.mxu2  ;;  %1422 = vmatpush.bf16.msra.mxu1 %v2124_v10 }
 0x295   :  { %v1252_v37 = vadd.f32 %v2758_v18, %v1251_v34 }
 0x296   :  { %v759_v38 = vpop.f32.mrf.mxu3 }
 0x297   :  { %v1265_v39 = vmax.f32 %v1252_v37, 0.0  ;;  %v2134_v37 = vld [vmem:[%s2960_s6 + $0x50] sm:$0xff] }
 0x299   :  { %v1270_v43 = vpack.c.bf16 %v1265_v39, %v1264_v7  ;;  %v2133_v39 = vld [vmem:[%s2960_s6 + $0x48] sm:$0xff] }
 0x29a   :  { %v1173_v53 = vpop.f32.mrf.mxu1 }
 0x29b   :  { %1970 = vmatmul.msk.bf16.gmra.mxu3 %vm241_vm3, %v1270_v43 }
 0x29c   :  { %v1254_v50 = vpop.f32.mrf.mxu2 }
 0x29d   :  { %v1255_v11 = vadd.f32 %v2758_v18, %v1254_v50  ;;  %v906_v18 = vadd.f32 %v2763_v28, %v2782_v57  ;;  %v908_v28 = vadd.f32 %v2773_v48, %v2791_v5  ;;  %v2129_v48 = vld [vmem:[%s2960_s6 + $0x28] sm:$0xff] }
 0x29e   :  { %v1021_v44 = vpop.f32.mrf.mxu3  ;;  %1455 = vmatpush.bf16.msrb.mxu0 %v2129_v48 }
 0x29f   :  { %v1045_v51 = vadd.f32 %v1021_v44, %v2768_v29  ;;  %v1266_v54 = vmax.f32 %v1255_v11, 0.0 }
 0x2a1   :  { %v1187_v52 = vadd.f32 %v1163_v45, %v1045_v51  ;;  %v1271_v36 = vpack.c.bf16 %v1266_v54, %v1266_v54 }
 0x2a2   :  { %v1175_v62 = vpop.f32.mrf.mxu1  ;;  %1456 = vmatpush.bf16.msrb.mxu0 %v2128_v27 }
 0x2a4   :  { %v1256_v59 = vpop.f32.mrf.mxu2 }
 0x2a5   :  { %v2137_v59 = vld [vmem:[%s2960_s6 + $0x68] sm:$0xff] }
 0x2a6   :  { %v1023_v35 = vpop.f32.mrf.mxu3 }
 0x2a7   :  { %v1046_v58 = vadd.f32 %v1023_v35, %v904_v55  ;;  %v2139_v55 = vld [vmem:[%s2960_s6 + $0x78] sm:$0xff] }
 0x2a9   :  { %v1188_v3 = vadd.f32 %v1165_v24, %v1046_v58  ;;  %v2858_v24 = vld [vmem:[%s2959_s5] ss:$0 sm:$0xff] }
 0x2aa   :  { %v1178_v1 = vpop.f32.mrf.mxu1 }
 0x2ab   :  { %1971 = vmatmul.msk.bf16.gmra.mxu3 %vm241_vm3, %v1271_v36 }
 0x2ae   :  { %v1026_v63 = vpop.f32.mrf.mxu3 }
 0x2af   :  { %v1047_v0 = vadd.f32 %v1026_v63, %v2777_v32 }
 0x2b1   :  { %v1189_v29 = vadd.f32 %v1168_v33, %v1047_v0  ;;  %v2135_v33 = vld [vmem:[%s2960_s6 + $0x58] sm:$0xff] }
 0x2b2   :  { %v1180_v2 = vpop.f32.mrf.mxu1 }
 0x2b6   :  { %v1028_v13 = vpop.f32.mrf.mxu3 }
 0x2b7   :  { %v1048_v14 = vadd.f32 %v1028_v13, %v906_v18 }
 0x2b9   :  { %v1190_v41 = vadd.f32 %v1170_v49, %v1048_v14 }
 0x2ba   :  { %v1183_v32 = vpop.f32.mrf.mxu1 }
 0x2be   :  { %v1031_v23 = vpop.f32.mrf.mxu3 }
 0x2bf   :  { %v1049_v42 = vadd.f32 %v1031_v23, %v2787_v60 }
 0x2c1   :  { %v2826_v9 = vadd.f32 %v1173_v53, %v1049_v42  ;;  %v1681_v42 = vld [vmem:[%s2961_s8] sm:$0xf] }
 0x2c2   :  { %v1185_v16 = vpop.f32.mrf.mxu1 }
 0x2c6   :  { %v1033_v57 = vpop.f32.mrf.mxu3 }
 0x2c7   :  { %v1050_v6 = vadd.f32 %v1033_v57, %v908_v28 }
 0x2c9   :  { %v2833_v12 = vadd.f32 %v1175_v62, %v1050_v6  ;;  %v2138_v62 = vld [vmem:[%s2960_s6 + $0x70] sm:$0xff] }
 0x2ce   :  { %v1036_v45 = vpop.f32.mrf.mxu3 }
 0x2cf   :  { %v1051_v17 = vadd.f32 %v1036_v45, %v2796_v21  ;;  %v2131_v21 = vld [vmem:[%s2960_s6 + $0x38] sm:$0xff] }
 0x2d0   :  { %1490 = vmatpush.bf16.msrb.mxu1 %v2131_v21 }
 0x2d1   :  { %v2836_v60 = vadd.f32 %v1178_v1, %v1051_v17 }
 0x2d6   :  { %v1038_v15 = vpop.f32.mrf.mxu3 }
 0x2d7   :  { %v1052_v19 = vadd.f32 %v1038_v15, %v2801_v56  ;;  %v2130_v56 = vld [vmem:[%s2960_s6 + $0x30] sm:$0xff] }
 0x2d8   :  { %1491 = vmatpush.bf16.msrb.mxu1 %v2130_v56 }
 0x2d9   :  { %v2839_v47 = vadd.f32 %v1180_v2, %v1052_v19 }
 0x2de   :  { %v1041_v20 = vpop.f32.mrf.mxu3 }
 0x2df   :  { %v1053_v22 = vadd.f32 %v1041_v20, %v911_v31 }
 0x2e1   :  { %v2841_v40 = vadd.f32 %v1183_v32, %v1053_v22  ;;  %v1721_v32 = vsel %vm1719_vm5, %v1681_v42, 0 }
 0x2e2   :  { %1730 = vmatpush.bf16.msrb.mxu2 %v1721_v32 }
 0x2e6   :  { %v1043_v5 = vpop.f32.mrf.mxu3 }
 0x2ee   :  { %v1305_v61 = vpop.f32.mrf.mxu3 }
 0x2ef   :  { %v1329_v25 = vadd.f32 %v1305_v61, %v1187_v52 }
 0x2f1   :  { %v1342_v30 = vadd.f32 %v2858_v24, %v1329_v25 }
 0x2f3   :  { %v1351_v26 = vmax.f32 %v1342_v30, 0.0 }
 0x2f5   :  { %v1360_v8 = vpack.c.bf16 %v1351_v26, %v1351_v26 }
 0x2f6   :  { %v1307_v31 = vpop.f32.mrf.mxu3 }
 0x2f7   :  { %v1330_v34 = vadd.f32 %v1307_v31, %v1188_v3  ;;  %1993 = vmatmul.msk.bf16.vlgmr.msra.gmra.mxu1 %vm1383_vm4, %v1360_v8  ;;  %v2136_v3 = vld [vmem:[%s2960_s6 + $0x60] sm:$0xff] }
 0x2f8   :  { %1560 = vmatpush.bf16.msra.mxu1 %v2135_v33 }
 0x2f9   :  { %v1343_v7 = vadd.f32 %v2858_v24, %v1330_v34  ;;  %v2142_v34 = vld [vmem:[%s2963_s9] sm:$0xff] }
 0x2fb   :  { %v1352_v38 = vmax.f32 %v1343_v7, 0.0 }
 0x2fc   :  { %1561 = vmatpush.bf16.msra.mxu1 %v2134_v37 }
 0x2fd   :  { %v1365_v43 = vpack.c.bf16 %v1352_v38, %v1352_v38  ;;  %v2145_v38 = vld [vmem:[%s2966_s11 + $0x8] sm:$0xff] }
 0x2fe   :  { %v1310_v49 = vpop.f32.mrf.mxu3  ;;  %1772 = vmatpush.bf16.msrb.mxu3 %v2145_v38 }
 0x2ff   :  { %1984 = vmatmul.msk.bf16.vlgmr.msra.gmra.mxu0 %vm1383_vm4, %v1365_v43  ;;  %v1331_v50 = vadd.f32 %v1310_v49, %v1189_v29 }
 0x300   :  { %1525 = vmatpush.bf16.msra.mxu0 %v2133_v39  ;;  %v2144_v39 = vld [vmem:[%s2966_s11] sm:$0xff] }
 0x301   :  { %v1344_v44 = vadd.f32 %v2858_v24, %v1331_v50 }
 0x302   :  { %1773 = vmatpush.bf16.msrb.mxu3 %v2144_v39 }
 0x303   :  { %v1353_v52 = vmax.f32 %v1344_v44, 0.0 }
 0x304   :  { %1526 = vmatpush.bf16.msra.mxu0 %v2132_v46 }
 0x305   :  { %v1428_v35 = vpack.c.bf16 %v1353_v52, %v1353_v52 }
 0x306   :  { %v1312_v51 = vpop.f32.mrf.mxu3 }
 0x307   :  { %v1332_v11 = vadd.f32 %v1312_v51, %v1190_v41 }
 0x309   :  { %v1345_v53 = vadd.f32 %v2858_v24, %v1332_v11 }
 0x30b   :  { %v1354_v54 = vmax.f32 %v1345_v53, 0.0 }
 0x30d   :  { %v1463_v36 = vpack.c.bf16 %v1354_v54, %v1354_v54 }
 0x30e   :  { %v1315_v58 = vpop.f32.mrf.mxu3 }
 0x30f   :  { %2006 = vmatmul.msk.bf16.vlgmr.msrb.gmra.mxu0 %vm1383_vm4, %v1428_v35  ;;  %2019 = vmatmul.msk.bf16.vlgmr.msrb.gmra.mxu1 %vm1383_vm4, %v1463_v36  ;;  %v1333_v63 = vadd.f32 %v1315_v58, %v2826_v9  ;;  %v2140_v9 = vld [vmem:[%s2960_s6 + $0x80] sm:$0xff] }
 0x310   :  { %1595 = vmatpush.bf16.msrb.mxu0 %v2137_v59  ;;  %1630 = vmatpush.bf16.msrb.mxu1 %v2139_v55  ;;  %v2151_v55 = vld [vmem:[%s2962_s7] ss:$0 sm:$0xff] }
 0x311   :  { %v1346_v0 = vadd.f32 %v2858_v24, %v1333_v63 }
 0x313   :  { %v1355_v18 = vmax.f32 %v1346_v0, 0.0 }
 0x314   :  { %1596 = vmatpush.bf16.msrb.mxu0 %v2136_v3  ;;  %1631 = vmatpush.bf16.msrb.mxu1 %v2138_v62 }
 0x315   :  { %v1498_v41 = vpack.c.bf16 %v1355_v18, %v1355_v18  ;;  %v2146_v18 = vld [vmem:[%s2968_s13] sm:$0xff] }
 0x316   :  { %v1317_v29 = vpop.f32.mrf.mxu3 }
 0x317   :  { %v1334_v1 = vadd.f32 %v1317_v29, %v2833_v12 }
 0x319   :  { %v1347_v13 = vadd.f32 %v2858_v24, %v1334_v1  ;;  %v2147_v1 = vld [vmem:[%s2968_s13 + $0x8] sm:$0xff] }
 0x31b   :  { %v1356_v14 = vmax.f32 %v1347_v13, 0.0  ;;  %v2152_v13 = vld [vmem:[%s2965_s10] ss:$0 sm:$0xff] }
 0x31d   :  { %v1533_v2 = vpack.c.bf16 %v1356_v14, %v1356_v14 }
 0x31e   :  { %v1320_v23 = vpop.f32.mrf.mxu3 }
 0x31f   :  { %2032 = vmatmul.msk.bf16.vlgmr.msra.gmra.mxu0 %vm1383_vm4, %v1498_v41  ;;  %2045 = vmatmul.msk.bf16.vlgmr.msra.gmra.mxu1 %vm1383_vm4, %v1533_v2  ;;  %v1335_v10 = vadd.f32 %v1320_v23, %v2836_v60 }
 0x320   :  { %1665 = vmatpush.bf16.msra.mxu0 %v2141_v4 }
 0x321   :  { %v1348_v28 = vadd.f32 %v2858_v24, %v1335_v10 }
 0x323   :  { %v1357_v12 = vmax.f32 %v1348_v28, 0.0 }
 0x324   :  { %1666 = vmatpush.bf16.msra.mxu0 %v2140_v9  ;;  %v2153_v9 = vld [vmem:[%s2967_s12] ss:$0 sm:$0xff] }
 0x325   :  { %v1568_v17 = vpack.c.bf16 %v1357_v12, %v1357_v12  ;;  %v2154_v12 = vld [vmem:[%s2969_s14] ss:$0 sm:$0xff] }
 0x326   :  { %v1322_v57 = vpop.f32.mrf.mxu3 }
 0x327   :  { %v1336_v6 = vadd.f32 %v1322_v57, %v2839_v47 }
 0x329   :  { %v1349_v16 = vadd.f32 %v2858_v24, %v1336_v6 }
 0x32b   :  { %v1358_v45 = vmax.f32 %v1349_v16, 0.0 }
 0x32d   :  { %v1603_v15 = vpack.c.bf16 %v1358_v45, %v1358_v45 }
 0x32e   :  { %v1325_v19 = vpop.f32.mrf.mxu3 }
 0x32f   :  { %v1337_v20 = vadd.f32 %v1325_v19, %v2841_v40  ;;  %2058 = vmatmul.msk.bf16.vlgmr.msrb.gmra.mxu0 %vm1383_vm4, %v1568_v17  ;;  %2071 = vmatmul.msk.bf16.vlgmr.msrb.gmra.mxu1 %vm1383_vm4, %v1603_v15  ;;  %v2143_v40 = vld [vmem:[%s2963_s9 + $0x8] sm:$0xff] }
 0x330   :  { %1708 = vmatpush.bf16.msra.mxu1 %v2143_v40  ;;  %1810 = vmatpush.bf16.msrb.mxu0 %v2147_v1 }
 0x331   :  { %v1350_v60 = vadd.f32 %v2858_v24, %v1337_v20  ;;  %v1679_v24 = vld [vmem:[%s2964_s1] sm:$0xff] }
 0x332   :  { %v1680_v8 = vpack.c.bf16 %v1679_v24, %v1679_v24 }
 0x333   :  { %v1359_v48 = vmax.f32 %v1350_v60, 0.0 }
 0x334   :  { %2094 = vmatmul.msk.bf16.vlgmr.msrb.gmra.mxu2 %vm1715_vm6, %v1680_v8  ;;  %1709 = vmatpush.bf16.msra.mxu1 %v2142_v34 }
 0x335   :  { %v1638_v5 = vpack.c.bf16 %v1359_v48, %v1359_v48  ;;  %1811 = vmatpush.bf16.msrb.mxu0 %v2146_v18 }
 0x336   :  { %v1327_v22 = vpop.f32.mrf.mxu3 }
 0x33f   :  { %2084 = vmatmul.msk.bf16.vlgmr.msra.gmra.mxu0 %vm1383_vm4, %v1638_v5 }
 0x374   :  { %v1424_v47 = vpop.f32.mrf.mxu1 }
 0x37c   :  { %v1396_v21 = vpop.f32.mrf.mxu0  ;;  %v1426_v27 = vpop.f32.mrf.mxu1 }
 0x37d   :  { %v1425_v43 = vadd.f32 %v1424_v47, %v1396_v21 }
 0x384   :  { %v1398_v56 = vpop.f32.mrf.mxu0 }
 0x38c   :  { %v1458_v61 = vpop.f32.mrf.mxu0  ;;  %v1493_v25 = vpop.f32.mrf.mxu1 }
 0x38d   :  { %v1462_v49 = vadd.f32 %v1458_v61, %v1425_v43 }
 0x38f   :  { %v1497_v44 = vadd.f32 %v1493_v25, %v1462_v49 }
 0x394   :  { %v1460_v30 = vpop.f32.mrf.mxu0  ;;  %v1495_v26 = vpop.f32.mrf.mxu1 }
 0x39c   :  { %v1528_v31 = vpop.f32.mrf.mxu0  ;;  %v1563_v33 = vpop.f32.mrf.mxu1 }
 0x39d   :  { %v1532_v51 = vadd.f32 %v1528_v31, %v1497_v44 }
 0x39f   :  { %v1567_v53 = vadd.f32 %v1563_v33, %v1532_v51 }
 0x3a4   :  { %v1530_v7 = vpop.f32.mrf.mxu0  ;;  %v1565_v37 = vpop.f32.mrf.mxu1 }
 0x3ac   :  { %v1598_v46 = vpop.f32.mrf.mxu0  ;;  %v1633_v50 = vpop.f32.mrf.mxu1 }
 0x3ad   :  { %v1602_v54 = vadd.f32 %v1598_v46, %v1567_v53 }
 0x3af   :  { %v1637_v59 = vadd.f32 %v1633_v50, %v1602_v54 }
 0x3b4   :  { %v1600_v11 = vpop.f32.mrf.mxu0  ;;  %v1635_v52 = vpop.f32.mrf.mxu1 }
 0x3b7   :  { %v1732_v0 = vpop.f32.mrf.mxu2 }
 0x3bc   :  { %v1668_v35 = vpop.f32.mrf.mxu0 }
 0x3bd   :  { %v1672_v36 = vadd.f32 %v1668_v35, %v1637_v59 }
 0x3bf   :  { %v1677_v58 = vadd.f32 %v2151_v55, %v1672_v36  ;;  %v1734_v29 = vpop.f32.mrf.mxu2 }
 0x3c1   :  { %v1678_v3 = vmax.f32 %v1677_v58, 0.0 }
 0x3c3   :  { %v1682_v62 = vpack.c.bf16 %v1678_v3, %v1678_v3 }
 0x3c4   :  { %v1670_v63 = vpop.f32.mrf.mxu0 }
 0x3c5   :  { %2093 = vmatmul.msk.bf16.vlgmr.msra.gmra.mxu1 %vm1383_vm4, %v1682_v62 }
 0x442   :  { %v1711_v14 = vpop.f32.mrf.mxu1 }
 0x443   :  { %v1733_v4 = vadd.f32 %v1732_v0, %v1711_v14 }
 0x445   :  { %v1740_v41 = vadd.f32 %v2152_v13, %v1733_v4 }
 0x447   :  { %v1741_v2 = vmax.f32 %v1740_v41, 0.0 }
 0x449   :  { %v1742_v23 = vpack.c.bf16 %v1741_v2, %v1741_v2 }
 0x44a   :  { %v1713_v42 = vpop.f32.mrf.mxu1 }
 0x44b   :  { %2103 = vmatmul.msk.bf16.vlgmr.msrb.gmra.mxu3 %vm1383_vm4, %v1742_v23 }
 0x4ce   :  { %v1775_v32 = vpop.f32.mrf.mxu3 }
 0x4cf   :  { %v1776_v10 = vadd.f32 %v2153_v9, %v1775_v32 }
 0x4d1   :  { %v1779_v28 = vmax.f32 %v1776_v10, 0.0 }
 0x4d3   :  { %v1780_v57 = vpack.c.bf16 %v1779_v28, %v1779_v28 }
 0x4d5   :  { %2112 = vmatmul.msk.bf16.vlgmr.msrb.gmra.mxu0 %vm1383_vm4, %v1780_v57 }
 0x4d6   :  { %v1777_v6 = vpop.f32.mrf.mxu3 }
 0x552   :  { %v1813_v16 = vpop.f32.mrf.mxu0 }
 0x553   :  { %v1814_v45 = vadd.f32 %v2154_v12, %v1813_v16 }
 0x555   :  { %1817 = vst [vmem:[%s2970_s15] sm:$0xff] %v1814_v45 }
 0x55a   :  { %v1815_v17 = vpop.f32.mrf.mxu0 }

</bundles_post_ra>
